<compile_context>
chip_gen: v7x
topology: tpu7x:2x2x1
jax: 0.10.0
libtpu: 0.0.40
codegen_flags: <defaults>
</compile_context>

<pallas_src>
import functools

import jax
import jax.numpy as jnp
from jax import lax
from jax.experimental import pallas as pl
from jax.experimental.pallas import tpu as pltpu

EPS = 1e-5                      # nn.BatchNorm2d default eps
LANE = 128                      # lane width

# Per-generation VMEM budget: large on v5e/v6e (128 MiB), frugal on v7x (64 MiB).
try:
    _VMEM_CAP = int(pltpu.get_tpu_info().vmem_capacity_bytes)
except Exception:               # unknown backend -> conservative fallback
    _VMEM_CAP = 64 * 1024 * 1024
VMEM_LIMIT = int(min(96 * 1024 * 1024, max(32 * 1024 * 1024, (_VMEM_CAP * 3) // 4)))
TM_DEFAULT = 2048               # upper bound; _auto_tm shrinks it to fit VMEM


def _round_up(x, m):
    return ((x + m - 1) // m) * m


def _auto_tm(M, K, Cp, res_bytes, out_bytes, tm_cap):
    """Largest M-tile (multiple of 16 for bf16 sublanes) fitting the VMEM budget."""
    budget = int(VMEM_LIMIT * 0.7)          # headroom for compiler scratch
    cap = TM_DEFAULT if tm_cap is None else tm_cap
    tm = min(_round_up(cap, 16), _round_up(max(M, 16), 16))

    def fits(t):
        # pass 1: double-buffered A (bf16) + y (bf16) + weight (bf16) + partials
        p1 = 2 * t * K * 2 + 2 * t * Cp * 2 + 2 * K * Cp * 2 + 2 * 8 * Cp * 4
        # pass 2: double-buffered y (bf16) + residual (bf16) + out + stats
        p2 = 2 * t * Cp * 2 + 2 * t * Cp * res_bytes + 2 * t * Cp * out_bytes + 2 * 8 * Cp * 4
        return max(p1, p2) <= budget

    while tm > 16 and not fits(tm):
        tm = _round_up(tm // 2, 16)
    return tm


# ----------------------------- Pallas kernels ------------------------------ #
def _gemm_stats_kernel(a_ref, w_ref, y_ref, part_ref):
    """Conv-as-GEMM (bf16 MXU, f32 acc): bf16 y tile + per-tile BN partial sums."""
    y = jnp.dot(a_ref[...], w_ref[...], preferred_element_type=jnp.float32)
    y_ref[...] = y.astype(y_ref.dtype)                 # bf16 writeback
    # Stats from the f32 accumulator (before the bf16 cast).  Note: variance is
    # later formed as E[y^2]-mean^2 with a clamp to >= 0 (adequate here since
    # conv outputs are near zero-mean; a Welford pass would be safer for large
    # DC offsets).
    part_ref[0:1, :] = jnp.sum(y, axis=0, keepdims=True)
    part_ref[1:2, :] = jnp.sum(y * y, axis=0, keepdims=True)
    part_ref[2:8, :] = jnp.zeros((6, y.shape[1]), jnp.float32)


def _bn_apply_kernel(y_ref, stats_ref, o_ref, *, apply_relu):
    """Folded BN (one FMA per element) + optional ReLU."""
    out = y_ref[...].astype(jnp.float32) * stats_ref[0:1, :] + stats_ref[1:2, :]
    if apply_relu:
        out = jnp.maximum(out, 0.0)
    o_ref[...] = out.astype(o_ref.dtype)


def _bn_apply_res_kernel(y_ref, stats_ref, res_ref, o_ref, *, apply_relu):
    """Folded BN + optional ReLU + fused residual add (af2 before the add)."""
    out = y_ref[...].astype(jnp.float32) * stats_ref[0:1, :] + stats_ref[1:2, :]
    if apply_relu:
        out = jnp.maximum(out, 0.0)
    out = out + res_ref[...].astype(jnp.float32)
    o_ref[...] = out.astype(o_ref.dtype)


# ------------------------------ fused conv+BN ------------------------------- #
def conv_bn(a, w_gemm, gamma, beta, *, apply_relu, residual=None,
            out_dtype=jnp.float32, tm=None):
    """conv(GEMM) + training-mode BN (+ReLU) (+residual), tiled over M rows.

    a       : [M, K]      im2col'd activations (bf16 or castable)
    w_gemm  : [K, Cout]   weights in GEMM layout
    residual: [M, Cout]   optional, added after ReLU
    Returns [M, Cout] in out_dtype.
    """
    M, K = a.shape
    cout = w_gemm.shape[1]
    # Lane-dense (pad to 128) only when padding waste is <= 2x; for small cout
    # the inflated y/out/res HBM traffic would dominate.
    Cp = _round_up(cout, LANE) if 2 * cout >= LANE else cout
    out_bytes = jnp.dtype(out_dtype).itemsize
    res_bytes = 2 if residual is not None else 0
    TM = _auto_tm(M, K, Cp, res_bytes, out_bytes, tm)
    Mp = _round_up(M, TM)                      # zero rows: harmless for stats
    n_tiles = Mp // TM                         # (we divide by the true M)

    a_p = jnp.pad(a.astype(jnp.bfloat16), ((0, Mp - M), (0, 0)))
    w_p = jnp.pad(w_gemm.astype(jnp.float32),
                  ((0, 0), (0, Cp - cout))).astype(jnp.bfloat16)
    g_p = jnp.pad(gamma.astype(jnp.float32), (0, Cp - cout))
    b_p = jnp.pad(beta.astype(jnp.float32), (0, Cp - cout))

    row_spec = pl.BlockSpec((TM, Cp), lambda i: (i, 0))
    stats_spec = pl.BlockSpec((8, Cp), lambda i: (0, 0))

    # Pass 1: GEMM + per-tile BN partial sums (independent tiles -> megacore).
    y, parts = pl.pallas_call(
        _gemm_stats_kernel,
        out_shape=(jax.ShapeDtypeStruct((Mp, Cp), jnp.bfloat16),
                   jax.ShapeDtypeStruct((n_tiles * 8, Cp), jnp.float32)),
        grid=(n_tiles,),
        in_specs=[pl.BlockSpec((TM, K), lambda i: (i, 0)),
                  pl.BlockSpec((K, Cp), lambda i: (0, 0))],
        out_specs=(row_spec, pl.BlockSpec((8, Cp), lambda i: (i, 0))),
        compiler_params=pltpu.CompilerParams(
            dimension_semantics=("parallel",),
            vmem_limit_bytes=VMEM_LIMIT),
    )(a_p, w_p)

    # Fold training-mode BN into per-channel scale/bias (tiny [Cp] math in JAX).
    p3 = parts.reshape(n_tiles, 8, Cp)
    mean = p3[:, 0, :].sum(axis=0) / M
    var = jnp.maximum(p3[:, 1, :].sum(axis=0) / M - mean * mean, 0.0)
    scale = g_p * lax.rsqrt(var + EPS)
    bias = b_p - mean * scale
    stats = jnp.zeros((8, Cp), jnp.float32).at[0].set(scale).at[1].set(bias)

    # Pass 2: y*scale + bias (+ReLU) (+residual) -- pure streaming FMA.
    if residual is not None:
        res_p = jnp.pad(residual.astype(jnp.bfloat16),
                        ((0, Mp - residual.shape[0]),
                         (0, Cp - residual.shape[1])))
        kernel = functools.partial(_bn_apply_res_kernel, apply_relu=apply_relu)
        operands = (y, stats, res_p)
        in_specs = [row_spec, stats_spec, row_spec]
    else:
        kernel = functools.partial(_bn_apply_kernel, apply_relu=apply_relu)
        operands = (y, stats)
        in_specs = [row_spec, stats_spec]

    # Reuse y's HBM buffer for the output when the dtypes match.
    aliases = {0: 0} if jnp.dtype(out_dtype) == jnp.dtype(jnp.bfloat16) else {}

    out = pl.pallas_call(
        kernel,
        out_shape=jax.ShapeDtypeStruct((Mp, Cp), out_dtype),
        grid=(n_tiles,),
        in_specs=in_specs,
        out_specs=pl.BlockSpec((TM, Cp), lambda i: (i, 0)),
        input_output_aliases=aliases,
        compiler_params=pltpu.CompilerParams(
            dimension_semantics=("parallel",),
            vmem_limit_bytes=VMEM_LIMIT),
    )(*operands)

    return out[:M, :cout]


# -------------------------------- JAX glue ---------------------------------- #
def _im2col(x_nhwc, k, pad, stride):
    N, H, W, C = x_nhwc.shape
    xp = jnp.pad(x_nhwc, ((0, 0), (pad, pad), (pad, pad), (0, 0)))
    OH = (H + 2 * pad - k) // stride + 1
    OW = (W + 2 * pad - k) // stride + 1
    cols = [xp[:, dy:dy + stride * OH:stride, dx:dx + stride * OW:stride, :]
            for dy in range(k) for dx in range(k)]
    a = jnp.concatenate(cols, axis=-1)               # [N, OH, OW, k*k*C]
    return a.reshape(N * OH * OW, k * k * C), OH, OW


def _w_to_gemm(w_oihw):
    # [Cout, Cin, kh, kw] -> [kh*kw*Cin, Cout], matching im2col column order.
    co, ci, kh, kw = w_oihw.shape
    return jnp.transpose(w_oihw, (2, 3, 1, 0)).reshape(kh * kw * ci, co)


@functools.partial(jax.jit, static_argnames=("kernel_size", "padding", "stride", "tm"))
def residual_block_forward(x_nchw, p, *, kernel_size, padding, stride, tm=None):
    N, Cin, H, W = x_nchw.shape
    # bf16 activations from the start: the im2col A matrix is built in bf16.
    x = jnp.transpose(x_nchw, (0, 2, 3, 1)).astype(jnp.bfloat16)      # NHWC
    cout = p["w1"].shape[0]

    # --- out = af1(bn1(conv_res1(x)))  (intermediate kept in bf16) ---
    a1, OH, OW = _im2col(x, kernel_size, padding, stride)
    out1 = conv_bn(a1, _w_to_gemm(p["w1"]), p["g1"], p["b1"],
                   apply_relu=True, out_dtype=jnp.bfloat16, tm=tm)

    # --- residual path (bf16 end to end) ---
    if stride != 1:
        a_ds = x[:, ::stride, ::stride, :].reshape(N * OH * OW, Cin)
        res = conv_bn(a_ds, _w_to_gemm(p["wd"]), p["gd"], p["bd"],
                      apply_relu=False, out_dtype=jnp.bfloat16, tm=tm)
    else:
        assert Cin == cout, "identity residual requires in_channels == out_channels"
        res = x.reshape(N * OH * OW, Cin)

    # --- out = af2(bn2(conv_res2(out))) + residual  (fused in pass 2) ---
    a2, _, _ = _im2col(out1.reshape(N, OH, OW, cout), kernel_size, padding, 1)
    out = conv_bn(a2, _w_to_gemm(p["w2"]), p["g2"], p["b2"],
                  apply_relu=True, residual=res, out_dtype=jnp.float32, tm=tm)

    return jnp.transpose(out.reshape(N, OH, OW, cout), (0, 3, 1, 2))  # NCHW


# --------------------------- pure-JAX references ---------------------------- #
def _ref_conv(x, w, stride, pad, bf16_ops):
    if bf16_ops:
        return lax.conv_general_dilated(
            x.astype(jnp.bfloat16), w.astype(jnp.bfloat16),
            (stride, stride), [(pad, pad), (pad, pad)],
            dimension_numbers=("NCHW", "OIHW", "NCHW"),
            preferred_element_type=jnp.float32)
    return lax.conv_general_dilated(
        x, w, (stride, stride), [(pad, pad), (pad, pad)],
        dimension_numbers=("NCHW", "OIHW", "NCHW"),
        precision=lax.Precision.HIGHEST)


def _ref_conv_bn(x, w, gamma, beta, stride, pad, bf16_ops, relu):
    y = _ref_conv(x, w, stride, pad, bf16_ops)
    mean = y.mean(axis=(0, 2, 3), keepdims=True)
    var = y.var(axis=(0, 2, 3), keepdims=True)        # biased, training BN
    scale = gamma[None, :, None, None] * lax.rsqrt(var + EPS)
    bias = beta[None, :, None, None] - mean * scale
    if bf16_ops:        # kernel stores y in bf16 before the BN apply
        y = y.astype(jnp.bfloat16).astype(jnp.float32)
    out = y * scale + bias
    return jnp.maximum(out, 0.0) if relu else out


def residual_block_reference(x, p, *, kernel_size, padding, stride,
                             bf16_ops=False):
    out1 = _ref_conv_bn(x, p["w1"], p["g1"], p["b1"], stride, padding,
                        bf16_ops, True)
    if bf16_ops:        # intermediate stored in bf16 on the kernel path
        out1 = out1.astype(jnp.bfloat16).astype(jnp.float32)
    out = _ref_conv_bn(out1, p["w2"], p["g2"], p["b2"], 1, padding,
                       bf16_ops, True)
    if stride != 1:
        res = _ref_conv_bn(x, p["wd"], p["gd"], p["bd"], stride, 0,
                           bf16_ops, False)
    else:
        res = x
    if bf16_ops:        # residual streamed in bf16 on the kernel path
        res = res.astype(jnp.bfloat16).astype(jnp.float32)
    return out + res


# ---------------------------------- main ------------------------------------ #
def _make_params(key, cin, cout, k, with_downsample):
    ks = jax.random.split(key, 8)
    p = {
        "w1": jax.random.normal(ks[1], (cout, cin, k, k), jnp.float32) * 0.1,
        "g1": 1.0 + 0.1 * jax.random.normal(ks[2], (cout,), jnp.float32),
        "b1": 0.1 * jax.random.normal(ks[3], (cout,), jnp.float32),
        "w2": jax.random.normal(ks[4], (cout, cout, k, k), jnp.float32) * 0.1,
        "g2": 1.0 + 0.1 * jax.random.normal(ks[5], (cout,), jnp.float32),
        "b2": 0.1 * jax.random.normal(ks[6], (cout,), jnp.float32),
    }
    if with_downsample:
        p["wd"] = jax.random.normal(ks[7], (cout, cin, 1, 1), jnp.float32) * 0.1
        p["gd"] = jnp.ones((cout,), jnp.float32)
        p["bd"] = jnp.zeros((cout,), jnp.float32)
    return p


def _check(x, p, *, k, pad, stride, tm):
    out = jax.block_until_ready(
        residual_block_forward(x, p, kernel_size=k, padding=pad,
                               stride=stride, tm=tm))
    N, _, H, W = x.shape
    cout = p["w1"].shape[0]
    OH = (H + 2 * pad - k) // stride + 1
    OW = (W + 2 * pad - k) // stride + 1
    assert out.shape == (N, cout, OH, OW), out.shape

    # Tight check vs a reference that models the kernel's bf16 arithmetic.
    ref_bf16 = residual_block_reference(x, p, kernel_size=k, padding=pad,
                                        stride=stride, bf16_ops=True)
    err_bf16 = float(jnp.max(jnp.abs(out - ref_bf16)))
    assert err_bf16 < 1e-2, f"bf16-matched reference mismatch: {err_bf16}"

    # Loose sanity check vs the full-f32 reference (bf16 operand rounding).
    ref_f32 = residual_block_reference(x, p, kernel_size=k, padding=pad,
                                       stride=stride, bf16_ops=False)
    err_f32 = float(jnp.max(jnp.abs(out - ref_f32)))
    assert err_f32 < 2e-1, f"f32 reference mismatch: {err_f32}"
    return err_bf16, err_f32


if __name__ == "__main__":
    key = jax.random.PRNGKey(0)
    k0, k1, k2, k3 = jax.random.split(key, 4)

    # Config 1: downsample path (stride != 1) — M = 128 rows, 2 M-tiles.
    x1 = jax.random.normal(k0, (2, 4, 16, 16), jnp.float32)
    p1 = _make_params(k1, 4, 8, 3, with_downsample=True)
    _check(x1, p1, k=3, pad=1, stride=2, tm=64)

    # Config 2: identity residual (stride == 1) — M = 512 rows, 8 M-tiles.
    x2 = jax.random.normal(k2, (2, 8, 16, 16), jnp.float32)
    p2 = _make_params(k3, 8, 8, 3, with_downsample=False)
    _check(x2, p2, k=3, pad=1, stride=1, tm=64)

    print("KERNEL_OK")
</pallas_src>

<mosaic_0001>
module attributes {stable_mosaic.version = 11 : i64} {
  func.func @_gemm_stats_kernel(%arg0: i32, %arg1: memref<64x36xbf16, #tpu.memory_space<vmem>>, %arg2: memref<36x8xbf16, #tpu.memory_space<vmem>>, %arg3: memref<64x8xbf16, #tpu.memory_space<vmem>>, %arg4: memref<8x8xf32, #tpu.memory_space<vmem>>) attributes {dimension_semantics = [#tpu.dimension_semantics<parallel>], iteration_bounds = array<i64: 2>, scalar_prefetch = 0 : i64, scratch_operands = 0 : i64, tpu.core_type = #tpu.core_type<tc>, window_params = [{transform_indices = @transform_0, window_bounds = array<i64: 64, 36>}, {pipeline_mode = #tpu.pipeline_mode<synchronous>, transform_indices = @transform_1, window_bounds = array<i64: 36, 8>}, {transform_indices = @transform_2, window_bounds = array<i64: 64, 8>}, {transform_indices = @transform_3, window_bounds = array<i64: 8, 8>}]} {
    %c0 = arith.constant 0 : index
    %c0_0 = arith.constant 0 : index
    %0 = vector.load %arg1[%c0, %c0_0] : memref<64x36xbf16, #tpu.memory_space<vmem>>, vector<64x36xbf16>
    %c0_1 = arith.constant 0 : index
    %c0_2 = arith.constant 0 : index
    %1 = vector.load %arg2[%c0_1, %c0_2] : memref<36x8xbf16, #tpu.memory_space<vmem>>, vector<36x8xbf16>
    %cst = arith.constant dense<0.000000e+00> : vector<64x8xf32>
    %2 = tpu.matmul %0, %1, %cst {dimension_numbers = #tpu.dot_dimension_numbers<[1], [0], [0], [1], [0, 0, 1, 1], [], []>} : vector<64x36xbf16>, vector<36x8xbf16>, vector<64x8xf32> -> vector<64x8xf32>
    %3 = arith.truncf %2 : vector<64x8xf32> to vector<64x8xbf16>
    %c0_3 = arith.constant 0 : index
    %c0_4 = arith.constant 0 : index
    %4 = vector.load %arg3[%c0_3, %c0_4] : memref<64x8xbf16, #tpu.memory_space<vmem>>, vector<64x8xbf16>
    tpu.vector_store %arg3[%c0_3, %c0_4], %3 {strides = array<i32>} : memref<64x8xbf16, #tpu.memory_space<vmem>>, vector<64x8xbf16>,
    %cst_5 = arith.constant dense<0.000000e+00> : vector<8xf32>
    %5 = vector.multi_reduction <add>, %2, %cst_5 [0] : vector<64x8xf32> to vector<8xf32>
    %6 = vector.shape_cast %5 : vector<8xf32> to vector<1x8xf32>
    %c0_6 = arith.constant 0 : index
    %c0_7 = arith.constant 0 : index
    %7 = vector.load %arg4[%c0_6, %c0_7] : memref<8x8xf32, #tpu.memory_space<vmem>>, vector<1x8xf32>
    tpu.vector_store %arg4[%c0_6, %c0_7], %6 {strides = array<i32>} : memref<8x8xf32, #tpu.memory_space<vmem>>, vector<1x8xf32>,
    %8 = arith.mulf %2, %2 : vector<64x8xf32>
    %cst_8 = arith.constant dense<0.000000e+00> : vector<8xf32>
    %9 = vector.multi_reduction <add>, %8, %cst_8 [0] : vector<64x8xf32> to vector<8xf32>
    %10 = vector.shape_cast %9 : vector<8xf32> to vector<1x8xf32>
    %c1 = arith.constant 1 : index
    %c0_9 = arith.constant 0 : index
    %11 = vector.load %arg4[%c1, %c0_9] : memref<8x8xf32, #tpu.memory_space<vmem>>, vector<1x8xf32>
    tpu.vector_store %arg4[%c1, %c0_9], %10 {strides = array<i32>} : memref<8x8xf32, #tpu.memory_space<vmem>>, vector<1x8xf32>,
    %cst_10 = arith.constant 0.000000e+00 : f32
    %12 = vector.broadcast %cst_10 : f32 to vector<6x8xf32>
    %c2 = arith.constant 2 : index
    %c0_11 = arith.constant 0 : index
    %13 = vector.load %arg4[%c2, %c0_11] : memref<8x8xf32, #tpu.memory_space<vmem>>, vector<6x8xf32>
    tpu.vector_store %arg4[%c2, %c0_11], %12 {strides = array<i32>} : memref<8x8xf32, #tpu.memory_space<vmem>>, vector<6x8xf32>,
    return
  }
  func.func @transform_0(%arg0: i32) -> (i32, i32) {
    %c0_i32 = arith.constant 0 : i32
    %c0_i32_0 = arith.constant 0 : i32
    return %arg0, %c0_i32 : i32, i32
  }
  func.func @transform_1(%arg0: i32) -> (i32, i32) {
    %c0_i32 = arith.constant 0 : i32
    %c0_i32_0 = arith.constant 0 : i32
    %c0_i32_1 = arith.constant 0 : i32
    return %c0_i32, %c0_i32_0 : i32, i32
  }
  func.func @transform_2(%arg0: i32) -> (i32, i32) {
    %c0_i32 = arith.constant 0 : i32
    %c0_i32_0 = arith.constant 0 : i32
    return %arg0, %c0_i32 : i32, i32
  }
  func.func @transform_3(%arg0: i32) -> (i32, i32) {
    %c0_i32 = arith.constant 0 : i32
    %c0_i32_0 = arith.constant 0 : i32
    return %arg0, %c0_i32 : i32, i32
  }
}

module attributes {stable_mosaic.version = 11 : i64} {
  func.func @_bn_apply_kernel(%arg0: i32, %arg1: memref<64x8xbf16, #tpu.memory_space<vmem>>, %arg2: memref<8x8xf32, #tpu.memory_space<vmem>>, %arg3: memref<64x8xbf16, #tpu.memory_space<vmem>>) attributes {dimension_semantics = [#tpu.dimension_semantics<parallel>], iteration_bounds = array<i64: 2>, scalar_prefetch = 0 : i64, scratch_operands = 0 : i64, tpu.core_type = #tpu.core_type<tc>, window_params = [{transform_indices = @transform_0, window_bounds = array<i64: 64, 8>}, {pipeline_mode = #tpu.pipeline_mode<synchronous>, transform_indices = @transform_1, window_bounds = array<i64: 8, 8>}, {transform_indices = @transform_2, window_bounds = array<i64: 64, 8>}]} {
    %c0 = arith.constant 0 : index
    %c0_0 = arith.constant 0 : index
    %0 = vector.load %arg1[%c0, %c0_0] : memref<64x8xbf16, #tpu.memory_space<vmem>>, vector<64x8xbf16>
    %1 = arith.extf %0 : vector<64x8xbf16> to vector<64x8xf32>
    %c0_1 = arith.constant 0 : index
    %c0_2 = arith.constant 0 : index
    %2 = vector.load %arg2[%c0_1, %c0_2] : memref<8x8xf32, #tpu.memory_space<vmem>>, vector<1x8xf32>
    %3 = vector.broadcast %2 : vector<1x8xf32> to vector<64x8xf32>
    %4 = arith.mulf %1, %3 : vector<64x8xf32>
    %c1 = arith.constant 1 : index
    %c0_3 = arith.constant 0 : index
    %5 = vector.load %arg2[%c1, %c0_3] : memref<8x8xf32, #tpu.memory_space<vmem>>, vector<1x8xf32>
    %6 = vector.broadcast %5 : vector<1x8xf32> to vector<64x8xf32>
    %7 = arith.addf %4, %6 : vector<64x8xf32>
    %cst = arith.constant 0.000000e+00 : f32
    %8 = vector.broadcast %cst : f32 to vector<64x8xf32>
    %9 = arith.maximumf %7, %8 : vector<64x8xf32>
    %10 = arith.truncf %9 : vector<64x8xf32> to vector<64x8xbf16>
    %c0_4 = arith.constant 0 : index
    %c0_5 = arith.constant 0 : index
    %11 = vector.load %arg3[%c0_4, %c0_5] : memref<64x8xbf16, #tpu.memory_space<vmem>>, vector<64x8xbf16>
    tpu.vector_store %arg3[%c0_4, %c0_5], %10 {strides = array<i32>} : memref<64x8xbf16, #tpu.memory_space<vmem>>, vector<64x8xbf16>,
    return
  }
  func.func @transform_0(%arg0: i32) -> (i32, i32) {
    %c0_i32 = arith.constant 0 : i32
    %c0_i32_0 = arith.constant 0 : i32
    return %arg0, %c0_i32 : i32, i32
  }
  func.func @transform_1(%arg0: i32) -> (i32, i32) {
    %c0_i32 = arith.constant 0 : i32
    %c0_i32_0 = arith.constant 0 : i32
    %c0_i32_1 = arith.constant 0 : i32
    return %c0_i32, %c0_i32_0 : i32, i32
  }
  func.func @transform_2(%arg0: i32) -> (i32, i32) {
    %c0_i32 = arith.constant 0 : i32
    %c0_i32_0 = arith.constant 0 : i32
    return %arg0, %c0_i32 : i32, i32
  }
}

module attributes {stable_mosaic.version = 11 : i64} {
  func.func @_gemm_stats_kernel(%arg0: i32, %arg1: memref<64x72xbf16, #tpu.memory_space<vmem>>, %arg2: memref<72x8xbf16, #tpu.memory_space<vmem>>, %arg3: memref<64x8xbf16, #tpu.memory_space<vmem>>, %arg4: memref<8x8xf32, #tpu.memory_space<vmem>>) attributes {dimension_semantics = [#tpu.dimension_semantics<parallel>], iteration_bounds = array<i64: 2>, scalar_prefetch = 0 : i64, scratch_operands = 0 : i64, tpu.core_type = #tpu.core_type<tc>, window_params = [{transform_indices = @transform_0, window_bounds = array<i64: 64, 72>}, {pipeline_mode = #tpu.pipeline_mode<synchronous>, transform_indices = @transform_1, window_bounds = array<i64: 72, 8>}, {transform_indices = @transform_2, window_bounds = array<i64: 64, 8>}, {transform_indices = @transform_3, window_bounds = array<i64: 8, 8>}]} {
    %c0 = arith.constant 0 : index
    %c0_0 = arith.constant 0 : index
    %0 = vector.load %arg1[%c0, %c0_0] : memref<64x72xbf16, #tpu.memory_space<vmem>>, vector<64x72xbf16>
    %c0_1 = arith.constant 0 : index
    %c0_2 = arith.constant 0 : index
    %1 = vector.load %arg2[%c0_1, %c0_2] : memref<72x8xbf16, #tpu.memory_space<vmem>>, vector<72x8xbf16>
    %cst = arith.constant dense<0.000000e+00> : vector<64x8xf32>
    %2 = tpu.matmul %0, %1, %cst {dimension_numbers = #tpu.dot_dimension_numbers<[1], [0], [0], [1], [0, 0, 1, 1], [], []>} : vector<64x72xbf16>, vector<72x8xbf16>, vector<64x8xf32> -> vector<64x8xf32>
    %3 = arith.truncf %2 : vector<64x8xf32> to vector<64x8xbf16>
    %c0_3 = arith.constant 0 : index
    %c0_4 = arith.constant 0 : index
    %4 = vector.load %arg3[%c0_3, %c0_4] : memref<64x8xbf16, #tpu.memory_space<vmem>>, vector<64x8xbf16>
    tpu.vector_store %arg3[%c0_3, %c0_4], %3 {strides = array<i32>} : memref<64x8xbf16, #tpu.memory_space<vmem>>, vector<64x8xbf16>,
    %cst_5 = arith.constant dense<0.000000e+00> : vector<8xf32>
    %5 = vector.multi_reduction <add>, %2, %cst_5 [0] : vector<64x8xf32> to vector<8xf32>
    %6 = vector.shape_cast %5 : vector<8xf32> to vector<1x8xf32>
    %c0_6 = arith.constant 0 : index
    %c0_7 = arith.constant 0 : index
    %7 = vector.load %arg4[%c0_6, %c0_7] : memref<8x8xf32, #tpu.memory_space<vmem>>, vector<1x8xf32>
    tpu.vector_store %arg4[%c0_6, %c0_7], %6 {strides = array<i32>} : memref<8x8xf32, #tpu.memory_space<vmem>>, vector<1x8xf32>,
    %8 = arith.mulf %2, %2 : vector<64x8xf32>
    %cst_8 = arith.constant dense<0.000000e+00> : vector<8xf32>
    %9 = vector.multi_reduction <add>, %8, %cst_8 [0] : vector<64x8xf32> to vector<8xf32>
    %10 = vector.shape_cast %9 : vector<8xf32> to vector<1x8xf32>
    %c1 = arith.constant 1 : index
    %c0_9 = arith.constant 0 : index
    %11 = vector.load %arg4[%c1, %c0_9] : memref<8x8xf32, #tpu.memory_space<vmem>>, vector<1x8xf32>
    tpu.vector_store %arg4[%c1, %c0_9], %10 {strides = array<i32>} : memref<8x8xf32, #tpu.memory_space<vmem>>, vector<1x8xf32>,
    %cst_10 = arith.constant 0.000000e+00 : f32
    %12 = vector.broadcast %cst_10 : f32 to vector<6x8xf32>
    %c2 = arith.constant 2 : index
    %c0_11 = arith.constant 0 : index
    %13 = vector.load %arg4[%c2, %c0_11] : memref<8x8xf32, #tpu.memory_space<vmem>>, vector<6x8xf32>
    tpu.vector_store %arg4[%c2, %c0_11], %12 {strides = array<i32>} : memref<8x8xf32, #tpu.memory_space<vmem>>, vector<6x8xf32>,
    return
  }
  func.func @transform_0(%arg0: i32) -> (i32, i32) {
    %c0_i32 = arith.constant 0 : i32
    %c0_i32_0 = arith.constant 0 : i32
    return %arg0, %c0_i32 : i32, i32
  }
  func.func @transform_1(%arg0: i32) -> (i32, i32) {
    %c0_i32 = arith.constant 0 : i32
    %c0_i32_0 = arith.constant 0 : i32
    %c0_i32_1 = arith.constant 0 : i32
    return %c0_i32, %c0_i32_0 : i32, i32
  }
  func.func @transform_2(%arg0: i32) -> (i32, i32) {
    %c0_i32 = arith.constant 0 : i32
    %c0_i32_0 = arith.constant 0 : i32
    return %arg0, %c0_i32 : i32, i32
  }
  func.func @transform_3(%arg0: i32) -> (i32, i32) {
    %c0_i32 = arith.constant 0 : i32
    %c0_i32_0 = arith.constant 0 : i32
    return %arg0, %c0_i32 : i32, i32
  }
}

module attributes {stable_mosaic.version = 11 : i64} {
  func.func @_gemm_stats_kernel(%arg0: i32, %arg1: memref<64x4xbf16, #tpu.memory_space<vmem>>, %arg2: memref<4x8xbf16, #tpu.memory_space<vmem>>, %arg3: memref<64x8xbf16, #tpu.memory_space<vmem>>, %arg4: memref<8x8xf32, #tpu.memory_space<vmem>>) attributes {dimension_semantics = [#tpu.dimension_semantics<parallel>], iteration_bounds = array<i64: 2>, scalar_prefetch = 0 : i64, scratch_operands = 0 : i64, tpu.core_type = #tpu.core_type<tc>, window_params = [{transform_indices = @transform_0, window_bounds = array<i64: 64, 4>}, {pipeline_mode = #tpu.pipeline_mode<synchronous>, transform_indices = @transform_1, window_bounds = array<i64: 4, 8>}, {transform_indices = @transform_2, window_bounds = array<i64: 64, 8>}, {transform_indices = @transform_3, window_bounds = array<i64: 8, 8>}]} {
    %c0 = arith.constant 0 : index
    %c0_0 = arith.constant 0 : index
    %0 = vector.load %arg1[%c0, %c0_0] : memref<64x4xbf16, #tpu.memory_space<vmem>>, vector<64x4xbf16>
    %c0_1 = arith.constant 0 : index
    %c0_2 = arith.constant 0 : index
    %1 = vector.load %arg2[%c0_1, %c0_2] : memref<4x8xbf16, #tpu.memory_space<vmem>>, vector<4x8xbf16>
    %cst = arith.constant dense<0.000000e+00> : vector<64x8xf32>
    %2 = tpu.matmul %0, %1, %cst {dimension_numbers = #tpu.dot_dimension_numbers<[1], [0], [0], [1], [0, 0, 1, 1], [], []>} : vector<64x4xbf16>, vector<4x8xbf16>, vector<64x8xf32> -> vector<64x8xf32>
    %3 = arith.truncf %2 : vector<64x8xf32> to vector<64x8xbf16>
    %c0_3 = arith.constant 0 : index
    %c0_4 = arith.constant 0 : index
    %4 = vector.load %arg3[%c0_3, %c0_4] : memref<64x8xbf16, #tpu.memory_space<vmem>>, vector<64x8xbf16>
    tpu.vector_store %arg3[%c0_3, %c0_4], %3 {strides = array<i32>} : memref<64x8xbf16, #tpu.memory_space<vmem>>, vector<64x8xbf16>,
    %cst_5 = arith.constant dense<0.000000e+00> : vector<8xf32>
    %5 = vector.multi_reduction <add>, %2, %cst_5 [0] : vector<64x8xf32> to vector<8xf32>
    %6 = vector.shape_cast %5 : vector<8xf32> to vector<1x8xf32>
    %c0_6 = arith.constant 0 : index
    %c0_7 = arith.constant 0 : index
    %7 = vector.load %arg4[%c0_6, %c0_7] : memref<8x8xf32, #tpu.memory_space<vmem>>, vector<1x8xf32>
    tpu.vector_store %arg4[%c0_6, %c0_7], %6 {strides = array<i32>} : memref<8x8xf32, #tpu.memory_space<vmem>>, vector<1x8xf32>,
    %8 = arith.mulf %2, %2 : vector<64x8xf32>
    %cst_8 = arith.constant dense<0.000000e+00> : vector<8xf32>
    %9 = vector.multi_reduction <add>, %8, %cst_8 [0] : vector<64x8xf32> to vector<8xf32>
    %10 = vector.shape_cast %9 : vector<8xf32> to vector<1x8xf32>
    %c1 = arith.constant 1 : index
    %c0_9 = arith.constant 0 : index
    %11 = vector.load %arg4[%c1, %c0_9] : memref<8x8xf32, #tpu.memory_space<vmem>>, vector<1x8xf32>
    tpu.vector_store %arg4[%c1, %c0_9], %10 {strides = array<i32>} : memref<8x8xf32, #tpu.memory_space<vmem>>, vector<1x8xf32>,
    %cst_10 = arith.constant 0.000000e+00 : f32
    %12 = vector.broadcast %cst_10 : f32 to vector<6x8xf32>
    %c2 = arith.constant 2 : index
    %c0_11 = arith.constant 0 : index
    %13 = vector.load %arg4[%c2, %c0_11] : memref<8x8xf32, #tpu.memory_space<vmem>>, vector<6x8xf32>
    tpu.vector_store %arg4[%c2, %c0_11], %12 {strides = array<i32>} : memref<8x8xf32, #tpu.memory_space<vmem>>, vector<6x8xf32>,
    return
  }
  func.func @transform_0(%arg0: i32) -> (i32, i32) {
    %c0_i32 = arith.constant 0 : i32
    %c0_i32_0 = arith.constant 0 : i32
    return %arg0, %c0_i32 : i32, i32
  }
  func.func @transform_1(%arg0: i32) -> (i32, i32) {
    %c0_i32 = arith.constant 0 : i32
    %c0_i32_0 = arith.constant 0 : i32
    %c0_i32_1 = arith.constant 0 : i32
    return %c0_i32, %c0_i32_0 : i32, i32
  }
  func.func @transform_2(%arg0: i32) -> (i32, i32) {
    %c0_i32 = arith.constant 0 : i32
    %c0_i32_0 = arith.constant 0 : i32
    return %arg0, %c0_i32 : i32, i32
  }
  func.func @transform_3(%arg0: i32) -> (i32, i32) {
    %c0_i32 = arith.constant 0 : i32
    %c0_i32_0 = arith.constant 0 : i32
    return %arg0, %c0_i32 : i32, i32
  }
}

module attributes {stable_mosaic.version = 11 : i64} {
  func.func @_bn_apply_kernel(%arg0: i32, %arg1: memref<64x8xbf16, #tpu.memory_space<vmem>>, %arg2: memref<8x8xf32, #tpu.memory_space<vmem>>, %arg3: memref<64x8xbf16, #tpu.memory_space<vmem>>) attributes {dimension_semantics = [#tpu.dimension_semantics<parallel>], iteration_bounds = array<i64: 2>, scalar_prefetch = 0 : i64, scratch_operands = 0 : i64, tpu.core_type = #tpu.core_type<tc>, window_params = [{transform_indices = @transform_0, window_bounds = array<i64: 64, 8>}, {pipeline_mode = #tpu.pipeline_mode<synchronous>, transform_indices = @transform_1, window_bounds = array<i64: 8, 8>}, {transform_indices = @transform_2, window_bounds = array<i64: 64, 8>}]} {
    %c0 = arith.constant 0 : index
    %c0_0 = arith.constant 0 : index
    %0 = vector.load %arg1[%c0, %c0_0] : memref<64x8xbf16, #tpu.memory_space<vmem>>, vector<64x8xbf16>
    %1 = arith.extf %0 : vector<64x8xbf16> to vector<64x8xf32>
    %c0_1 = arith.constant 0 : index
    %c0_2 = arith.constant 0 : index
    %2 = vector.load %arg2[%c0_1, %c0_2] : memref<8x8xf32, #tpu.memory_space<vmem>>, vector<1x8xf32>
    %3 = vector.broadcast %2 : vector<1x8xf32> to vector<64x8xf32>
    %4 = arith.mulf %1, %3 : vector<64x8xf32>
    %c1 = arith.constant 1 : index
    %c0_3 = arith.constant 0 : index
    %5 = vector.load %arg2[%c1, %c0_3] : memref<8x8xf32, #tpu.memory_space<vmem>>, vector<1x8xf32>
    %6 = vector.broadcast %5 : vector<1x8xf32> to vector<64x8xf32>
    %7 = arith.addf %4, %6 : vector<64x8xf32>
    %8 = arith.truncf %7 : vector<64x8xf32> to vector<64x8xbf16>
    %c0_4 = arith.constant 0 : index
    %c0_5 = arith.constant 0 : index
    %9 = vector.load %arg3[%c0_4, %c0_5] : memref<64x8xbf16, #tpu.memory_space<vmem>>, vector<64x8xbf16>
    tpu.vector_store %arg3[%c0_4, %c0_5], %8 {strides = array<i32>} : memref<64x8xbf16, #tpu.memory_space<vmem>>, vector<64x8xbf16>,
    return
  }
  func.func @transform_0(%arg0: i32) -> (i32, i32) {
    %c0_i32 = arith.constant 0 : i32
    %c0_i32_0 = arith.constant 0 : i32
    return %arg0, %c0_i32 : i32, i32
  }
  func.func @transform_1(%arg0: i32) -> (i32, i32) {
    %c0_i32 = arith.constant 0 : i32
    %c0_i32_0 = arith.constant 0 : i32
    %c0_i32_1 = arith.constant 0 : i32
    return %c0_i32, %c0_i32_0 : i32, i32
  }
  func.func @transform_2(%arg0: i32) -> (i32, i32) {
    %c0_i32 = arith.constant 0 : i32
    %c0_i32_0 = arith.constant 0 : i32
    return %arg0, %c0_i32 : i32, i32
  }
}

module attributes {stable_mosaic.version = 11 : i64} {
  func.func @_bn_apply_res_kernel(%arg0: i32, %arg1: memref<64x8xbf16, #tpu.memory_space<vmem>>, %arg2: memref<8x8xf32, #tpu.memory_space<vmem>>, %arg3: memref<64x8xbf16, #tpu.memory_space<vmem>>, %arg4: memref<64x8xf32, #tpu.memory_space<vmem>>) attributes {dimension_semantics = [#tpu.dimension_semantics<parallel>], iteration_bounds = array<i64: 2>, scalar_prefetch = 0 : i64, scratch_operands = 0 : i64, tpu.core_type = #tpu.core_type<tc>, window_params = [{transform_indices = @transform_0, window_bounds = array<i64: 64, 8>}, {pipeline_mode = #tpu.pipeline_mode<synchronous>, transform_indices = @transform_1, window_bounds = array<i64: 8, 8>}, {transform_indices = @transform_2, window_bounds = array<i64: 64, 8>}, {transform_indices = @transform_3, window_bounds = array<i64: 64, 8>}]} {
    %c0 = arith.constant 0 : index
    %c0_0 = arith.constant 0 : index
    %0 = vector.load %arg1[%c0, %c0_0] : memref<64x8xbf16, #tpu.memory_space<vmem>>, vector<64x8xbf16>
    %1 = arith.extf %0 : vector<64x8xbf16> to vector<64x8xf32>
    %c0_1 = arith.constant 0 : index
    %c0_2 = arith.constant 0 : index
    %2 = vector.load %arg2[%c0_1, %c0_2] : memref<8x8xf32, #tpu.memory_space<vmem>>, vector<1x8xf32>
    %3 = vector.broadcast %2 : vector<1x8xf32> to vector<64x8xf32>
    %4 = arith.mulf %1, %3 : vector<64x8xf32>
    %c1 = arith.constant 1 : index
    %c0_3 = arith.constant 0 : index
    %5 = vector.load %arg2[%c1, %c0_3] : memref<8x8xf32, #tpu.memory_space<vmem>>, vector<1x8xf32>
    %6 = vector.broadcast %5 : vector<1x8xf32> to vector<64x8xf32>
    %7 = arith.addf %4, %6 : vector<64x8xf32>
    %cst = arith.constant 0.000000e+00 : f32
    %8 = vector.broadcast %cst : f32 to vector<64x8xf32>
    %9 = arith.maximumf %7, %8 : vector<64x8xf32>
    %c0_4 = arith.constant 0 : index
    %c0_5 = arith.constant 0 : index
    %10 = vector.load %arg3[%c0_4, %c0_5] : memref<64x8xbf16, #tpu.memory_space<vmem>>, vector<64x8xbf16>
    %11 = arith.extf %10 : vector<64x8xbf16> to vector<64x8xf32>
    %12 = arith.addf %9, %11 : vector<64x8xf32>
    %c0_6 = arith.constant 0 : index
    %c0_7 = arith.constant 0 : index
    %13 = vector.load %arg4[%c0_6, %c0_7] : memref<64x8xf32, #tpu.memory_space<vmem>>, vector<64x8xf32>
    tpu.vector_store %arg4[%c0_6, %c0_7], %12 {strides = array<i32>} : memref<64x8xf32, #tpu.memory_space<vmem>>, vector<64x8xf32>,
    return
  }
  func.func @transform_0(%arg0: i32) -> (i32, i32) {
    %c0_i32 = arith.constant 0 : i32
    %c0_i32_0 = arith.constant 0 : i32
    return %arg0, %c0_i32 : i32, i32
  }
  func.func @transform_1(%arg0: i32) -> (i32, i32) {
    %c0_i32 = arith.constant 0 : i32
    %c0_i32_0 = arith.constant 0 : i32
    %c0_i32_1 = arith.constant 0 : i32
    return %c0_i32, %c0_i32_0 : i32, i32
  }
  func.func @transform_2(%arg0: i32) -> (i32, i32) {
    %c0_i32 = arith.constant 0 : i32
    %c0_i32_0 = arith.constant 0 : i32
    return %arg0, %c0_i32 : i32, i32
  }
  func.func @transform_3(%arg0: i32) -> (i32, i32) {
    %c0_i32 = arith.constant 0 : i32
    %c0_i32_0 = arith.constant 0 : i32
    return %arg0, %c0_i32 : i32, i32
  }
}

</mosaic_0001>

<bundles_post_ra>
// kernel: residual_block_forward.7
= control target key start
LH: loop header
LB: loop body
LE: loop exit
PB: predicated region body
PF: predicated region fallthrough
CT: control target
= control target key end

     0   :  { %s373_s9 = smov 0   ;;  %s411_s0 = inlined_call_operand.vmem [shape: bf16[128,8], index: 0, kind: input, shape index: {}, may-alias: {0,2}]   ;;  %s412_s1 = inlined_call_operand.vmem [shape: f32[8,8], index: 1, kind: input, shape index: {}]   ;;  %s413_s2 = inlined_call_operand.vmem [shape: bf16[128,8], index: 2, kind: output, shape index: {}, may-alias: {0,2}]  }
   0x1 LB: > { %s294_s10 = sadd.s32 4294967295, %s356_s9   ;;  %p298_p0 = scmp.ge.s32.totalorder %s356_s9, 1  ;;  %s356_s9 = sphi %s373_s9, %s12_s9  }
   0x2   : > { %p113_p1 = scmp.lt.s32.totalorder %s356_s9, 3 }
   0x4   : > { %p114_p2 = pnand %p298_p0, %p113_p1 }
   0x5   : > { %s299_s11 = sshll.u32 (!%p114_p2), %s294_s10, 3  ;;  %v303_v0 = vld [vmem:[%s412_s1] ss:$0 sm:$0xff] (!%p114_p2)  ;;  %vm229_vm0 = vcmask (!%p114_p2), 60416   ;;  %v304_v9 = vld [vmem:[%s412_s1 + $0x1] ss:$0 sm:$0xff] (!%p114_p2) }
   0x6   : > { %117 = sbr.rel (%p114_p2) target bundleno = 31 (0x1f), region = 28  ;;  %p136_p3 = scmp.lt.s32.totalorder (!%p114_p2), %s299_s11, 15 }
   0xd   : > { %s415_s11 = smov (!%p136_p3, %s299_s11), 15 }
   0xe   : > { %s300_s12 = sshll.u32 %s415_s11, 2 }
   0xf   : > { %s139_s15 = scalar_lea.vmem %s411_s0, %s300_s12  ;;  %s145_s22 = scalar_lea.vmem %s413_s2, %s300_s12 }
  0x10   : > { %v324_v1 = vld [vmem:[%s139_s15] sm:$0xff]   ;;  %v339_v2 = vld [vmem:[%s139_s15 + $0x8] sm:$0xff]   ;;  %v340_v3 = vld [vmem:[%s139_s15 + $0x10] sm:$0xff]  }
  0x11   : > { %v325_v4 = vunpack.c.l.bf16 %v324_v1  ;;  %v341_v5 = vld [vmem:[%s139_s15 + $0x18] sm:$0xff]   ;;  %v326_v6 = vunpack.c.h.bf16 %v324_v1  ;;  %v329_v7 = vunpack.c.l.bf16 %v339_v2  ;;  %v330_v8 = vunpack.c.h.bf16 %v339_v2 }
  0x12   : > { %v333_v10 = vunpack.c.l.bf16 %v340_v3  ;;  %v334_v11 = vunpack.c.h.bf16 %v340_v3  ;;  %v337_v12 = vunpack.c.l.bf16 %v341_v5  ;;  %v338_v13 = vunpack.c.h.bf16 %v341_v5 }
  0x13   : > { %v168_v14 = vmul.f32 %v325_v4, %v303_v0  ;;  %v169_v15 = vmul.f32 %v326_v6, %v303_v0  ;;  %v170_v16 = vmul.f32 %v329_v7, %v303_v0  ;;  %v171_v17 = vmul.f32 %v330_v8, %v303_v0 }
  0x14   : > { %v172_v18 = vmul.f32 %v333_v10, %v303_v0  ;;  %v173_v19 = vmul.f32 %v334_v11, %v303_v0  ;;  %v174_v20 = vmul.f32 %v337_v12, %v303_v0  ;;  %v175_v21 = vmul.f32 %v338_v13, %v303_v0 }
  0x15   : > { %v181_v22 = vadd.f32 %v304_v9, %v168_v14  ;;  %v182_v23 = vadd.f32 %v304_v9, %v169_v15  ;;  %v183_v24 = vadd.f32 %v304_v9, %v170_v16  ;;  %v184_v25 = vadd.f32 %v304_v9, %v171_v17 }
  0x16   : > { %v185_v26 = vadd.f32 %v304_v9, %v172_v18  ;;  %v186_v27 = vadd.f32 %v304_v9, %v173_v19  ;;  %v187_v28 = vadd.f32 %v304_v9, %v174_v20  ;;  %v188_v29 = vadd.f32 %v304_v9, %v175_v21 }
  0x17   : > { %v189_v30 = vmax.f32 %v181_v22, 0.0  ;;  %v190_v31 = vmax.f32 %v182_v23, 0.0  ;;  %v191_v32 = vmax.f32 %v183_v24, 0.0  ;;  %v192_v33 = vmax.f32 %v184_v25, 0.0 }
  0x18   : > { %v193_v34 = vmax.f32 %v185_v26, 0.0  ;;  %v194_v35 = vmax.f32 %v186_v27, 0.0  ;;  %v195_v36 = vmax.f32 %v187_v28, 0.0  ;;  %v196_v37 = vmax.f32 %v188_v29, 0.0 }
  0x19   : > { %v315_v38 = vpack.c.bf16 %v189_v30, %v189_v30  ;;  %v316_v39 = vpack.c.bf16 %v190_v31, %v190_v31  ;;  %v317_v40 = vpack.c.bf16 %v191_v32, %v191_v32  ;;  %v318_v41 = vpack.c.bf16 %v192_v33, %v192_v33 }
  0x1a   : > { %v319_v42 = vpack.c.bf16 %v193_v34, %v193_v34  ;;  %v320_v43 = vpack.c.bf16 %v194_v35, %v194_v35  ;;  %v321_v44 = vpack.c.bf16 %v195_v36, %v195_v36  ;;  %v322_v45 = vpack.c.bf16 %v196_v37, %v196_v37 }
  0x1b   : > { %230 = vst.msk [vmem:[%s145_s22] sm:$0xf] %vm229_vm0, %v315_v38  ;;  %231 = vst.msk [vmem:[%s145_s22 + $0x4] sm:$0xf] %vm229_vm0, %v316_v39 }
  0x1c   : > { %232 = vst.msk [vmem:[%s145_s22 + $0x8] sm:$0xf] %vm229_vm0, %v317_v40  ;;  %233 = vst.msk [vmem:[%s145_s22 + $0xc] sm:$0xf] %vm229_vm0, %v318_v41 }
  0x1d   : > { %234 = vst.msk [vmem:[%s145_s22 + $0x10] sm:$0xf] %vm229_vm0, %v319_v42  ;;  %235 = vst.msk [vmem:[%s145_s22 + $0x14] sm:$0xf] %vm229_vm0, %v320_v43 }
  0x1e   : > { %236 = vst.msk [vmem:[%s145_s22 + $0x18] sm:$0xf] %vm229_vm0, %v321_v44  ;;  %237 = vst.msk [vmem:[%s145_s22 + $0x1c] sm:$0xf] %vm229_vm0, %v322_v45 }
  0x1f PF: > { %s12_s9 = sadd.s32 1, %s356_s9  }
  0x20   : > { %p9_p4 = scmp.ge.s32.totalorder %s12_s9, 4  }
  0x22   :  { %11 = sbr.rel (!%p9_p4) target bundleno = 1 (0x1), region = 58 }

// kernel: residual_block_forward.6
= control target key start
LH: loop header
LB: loop body
LE: loop exit
PB: predicated region body
PF: predicated region fallthrough
CT: control target
= control target key end

     0   :  { %s613_s12 = smov 0   ;;  %s686_s0 = inlined_call_operand.vmem [shape: bf16[128,36], index: 0, kind: input, shape index: {}]   ;;  %s687_s1 = inlined_call_operand.vmem [shape: bf16[36,8], index: 1, kind: input, shape index: {}]   ;;  %s688_s2 = inlined_call_operand.vmem [shape: bf16[128,8], index: 2, kind: output, shape index: {0}]   ;;  %s689_s3 = inlined_call_operand.vmem [shape: f32[16,8], index: 3, kind: output, shape index: {1}]  }
   0x1 LB: > { %s619_s13 = sadd.s32 4294967295, %s590_s12   ;;  %p504_p0 = scmp.ge.s32.totalorder %s590_s12, 1  ;;  %s590_s12 = sphi %s613_s12, %s14_s12  }
   0x2   : > { %p141_p1 = scmp.lt.s32.totalorder %s590_s12, 3 }
   0x4   : > { %p142_p2 = pnand %p504_p0, %p141_p1 }
   0x5   : > { %v577_v0 = vld [vmem:[%s687_s1] sm:$0xff] (!%p142_p2)   ;;  %v578_v1 = vld [vmem:[%s687_s1 + $0x8] sm:$0xff] (!%p142_p2)   ;;  %s505_s18 = sshll.u32 (!%p142_p2), %s619_s13, 3  ;;  %v579_v2 = vld [vmem:[%s687_s1 + $0x10] ss:$0 sps:$4 sm:$0x33] (!%p142_p2)  }
   0x6   : > { %145 = sbr.rel (%p142_p2) target bundleno = 263 (0x107), region = 28  ;;  %546 = vmatprep.subr.bf16.mxu0 (!%p142_p2), %v577_v0  ;;  %560 = vmatprep.subr.bf16.mxu1 (!%p142_p2), %v577_v0  ;;  %p170_p3 = scmp.lt.s32.totalorder (!%p142_p2), %s505_s18, 15  ;;  %vm247_vm0 = vcmask (!%p142_p2), 1041408   ;;  %vm234_vm1 = vcmask (!%p142_p2), 293888   ;;  %vm411_vm2 = vcmask (!%p142_p2), 62464   ;;  %v592_v8 = vmov (!%p142_p2), 0.0  }
   0x7   : > { %547 = vmatpush3.bf16.msra.mxu0 (!%p142_p2), %v577_v0  ;;  %563 = vmatpush3.bf16.msra.mxu1 (!%p142_p2), %v577_v0  ;;  %v249_v3 = vsel (!%p142_p2), %vm247_vm0, %v579_v2, 0  ;;  %p181_p4 = scmp.lt.s32.totalorder (!%p142_p2), %s619_s13, 1  ;;  %vm348_vm3 = vcmask (!%p142_p2), 60416   ;;  %vm357_vm4 = vcmask (!%p142_p2), 64512   ;;  %vm379_vm5 = vcmask (!%p142_p2), 57344  }
   0x8   : > { %548 = vmatprep.subr.bf16.mxu0 (!%p142_p2), %v578_v1  ;;  %561 = vmatprep.subr.bf16.mxu1 (!%p142_p2), %v578_v1 }
   0xb   : > { %549 = vmatpush3.bf16.msra.mxu0 (!%p142_p2), %v578_v1  ;;  %564 = vmatpush3.bf16.msra.mxu1 (!%p142_p2), %v578_v1 }
   0xc   : > { %566 = vmatprep.subr.msk.bf16.mxu0 (!%p142_p2), %vm247_vm0, %v579_v2  ;;  %567 = vmatprep.subr.msk.bf16.mxu1 (!%p142_p2), %vm247_vm0, %v579_v2 }
   0xd   : > { %s691_s18 = smov (!%p170_p3, %s505_s18), 15  ;;  %s693_s13 = smov (!%p181_p4, %s619_s13), 1 }
   0xe   : > { %s506_s21 = sshll.u32 %s691_s18, 2  ;;  %s509_s25 = sshll.u32 %s693_s13, 3 }
   0xf   : > { %s173_s24 = scalar_lea.vmem %s686_s0, %s506_s21  ;;  %551 = vmatpush3.bf16.msra.mxu0 %v249_v3  ;;  %565 = vmatpush3.bf16.msra.mxu1 %v249_v3  ;;  %s641_s28 = scalar_lea.vmem %s689_s3, %s509_s25 }
  0x10   : > { %v580_v4 = vld [vmem:[%s173_s24] sm:$0xff]   ;;  %v581_v5 = vld [vmem:[%s173_s24 + $0x8] sm:$0xff]   ;;  %v582_v6 = vld [vmem:[%s173_s24 + $0x10] sm:$0xff]   ;;  %412 = vst.msk [vmem:[%s641_s28 + $0x2] sm:$0x3f] %vm411_vm2, %v592_v8  ;;  %s647_s4 = scalar_lea.vmem %s688_s2, %s506_s21 }
  0x11   : > { %552 = vmatprep.mubr.msk.bf16.mxu0 %vm234_vm1, %v580_v4  ;;  %v583_v7 = vld [vmem:[%s173_s24 + $0x18] sm:$0xff]   ;;  %556 = vmatprep.mubr.msk.bf16.mxu1 %vm234_vm1, %v582_v6 }
  0x12   : > { %553 = vmatmul.mubr.msk.bf16.vlgmr.msra.gmra.mrb[0].mxu0 %vm234_vm1, %v581_v5  ;;  %557 = vmatmul.mubr.msk.bf16.vlgmr.msra.gmra.mrb[0].mxu1 %vm234_vm1, %v583_v7 }
  0xe5   : > { %v554_v9 = vpop.f32.mrb[0].mxu0  ;;  %v558_v10 = vpop.f32.mrb[0].mxu1 }
  0xe6   : > { %v533_v11 = vpack.c.bf16 %v554_v9, %v554_v9  ;;  %v285_v12 = vpop.f32.mrb[1].mxu0  ;;  %v537_v13 = vpack.c.bf16 %v558_v10, %v558_v10  ;;  %v301_v14 = vpop.f32.mrb[1].mxu1  ;;  %v383_v19 = vmul.f32 %v554_v9, %v554_v9  ;;  %v361_v27 = vsel %vm357_vm4, %v554_v9, 0.0 }
  0xe7   : > { %v531_v15 = vpack.c.bf16 %v285_v12, %v285_v12  ;;  %v381_v16 = vmul.f32 %v285_v12, %v285_v12  ;;  %v555_v17 = vpop.f32.mrb[2].mxu0  ;;  %v559_v18 = vpop.f32.mrb[2].mxu1  ;;  %v358_v23 = vsel %vm357_vm4, %v285_v12, 0.0  ;;  %v535_v30 = vpack.c.bf16 %v301_v14, %v301_v14 }
  0xe8   : > { %351 = vst.msk [vmem:[%s647_s4 + $0x8] sm:$0xf] %vm348_vm3, %v533_v11  ;;  %v534_v20 = vpack.c.bf16 %v555_v17, %v555_v17  ;;  %v288_v21 = vpop.f32.mrb[3].mxu0  ;;  %355 = vst.msk [vmem:[%s647_s4 + $0x18] sm:$0xf] %vm348_vm3, %v537_v13  ;;  %v304_v22 = vpop.f32.mrb[3].mxu1  ;;  %v384_v28 = vmul.f32 %v555_v17, %v555_v17  ;;  %v385_v33 = vmul.f32 %v301_v14, %v301_v14 }
  0xe9   : > { %349 = vst.msk [vmem:[%s647_s4] sm:$0xf] %vm348_vm3, %v531_v15  ;;  %v532_v24 = vpack.c.bf16 %v288_v21, %v288_v21  ;;  %v359_v25 = vsel %vm357_vm4, %v288_v21, 0.0  ;;  %v382_v26 = vmul.f32 %v288_v21, %v288_v21  ;;  %v389_v31 = vsel %vm357_vm4, %v381_v16, 0.0  ;;  %353 = vst.msk [vmem:[%s647_s4 + $0x10] sm:$0xf] %vm348_vm3, %v535_v30 }
  0xea   : > { %352 = vst.msk [vmem:[%s647_s4 + $0xc] sm:$0xf] %vm348_vm3, %v534_v20  ;;  %v360_v29 = vadd.f32 %v359_v25, %v358_v23  ;;  %v538_v34 = vpack.c.bf16 %v559_v18, %v559_v18  ;;  %v392_v37 = vsel %vm357_vm4, %v383_v19, 0.0  ;;  %v363_v38 = vsel %vm357_vm4, %v555_v17, 0.0 }
  0xeb   : > { %350 = vst.msk [vmem:[%s647_s4 + $0x4] sm:$0xf] %vm348_vm3, %v532_v24  ;;  %v390_v32 = vsel %vm357_vm4, %v382_v26, 0.0  ;;  %v365_v39 = vsel %vm357_vm4, %v301_v14, 0.0  ;;  %v536_v40 = vpack.c.bf16 %v304_v22, %v304_v22  ;;  %v394_v43 = vsel %vm357_vm4, %v384_v28, 0.0 }
  0xec   : > { %v362_v35 = vadd.f32 %v361_v27, %v360_v29  ;;  %v391_v36 = vadd.f32 %v390_v32, %v389_v31  ;;  %356 = vst.msk [vmem:[%s647_s4 + $0x1c] sm:$0xf] %vm348_vm3, %v538_v34  ;;  %v396_v44 = vsel %vm357_vm4, %v385_v33, 0.0  ;;  %v386_v45 = vmul.f32 %v304_v22, %v304_v22 }
  0xed   : > { %354 = vst.msk [vmem:[%s647_s4 + $0x14] sm:$0xf] %vm348_vm3, %v536_v40  ;;  %v387_v48 = vmul.f32 %v558_v10, %v558_v10  ;;  %v367_v49 = vsel %vm357_vm4, %v304_v22, 0.0  ;;  %v369_v52 = vsel %vm357_vm4, %v558_v10, 0.0  ;;  %v388_v53 = vmul.f32 %v559_v18, %v559_v18 }
  0xee   : > { %v393_v41 = vadd.f32 %v392_v37, %v391_v36  ;;  %v364_v42 = vadd.f32 %v363_v38, %v362_v35  ;;  %v398_v54 = vsel %vm357_vm4, %v386_v45, 0.0  ;;  %v371_v58 = vsel %vm357_vm4, %v559_v18, 0.0 }
  0xef   : > { %v400_v57 = vsel %vm357_vm4, %v387_v48, 0.0  ;;  %v402_v61 = vsel %vm357_vm4, %v388_v53, 0.0 }
  0xf0   : > { %v366_v46 = vadd.f32 %v365_v39, %v364_v42  ;;  %v395_v47 = vadd.f32 %v394_v43, %v393_v41 }
  0xf2   : > { %v397_v50 = vadd.f32 %v396_v44, %v395_v47  ;;  %v368_v51 = vadd.f32 %v367_v49, %v366_v46 }
  0xf4   : > { %v370_v55 = vadd.f32 %v369_v52, %v368_v51  ;;  %v399_v56 = vadd.f32 %v398_v54, %v397_v50 }
  0xf6   : > { %v372_v59 = vadd.f32 %v371_v58, %v370_v55  ;;  %v401_v60 = vadd.f32 %v400_v57, %v399_v56 }
  0xf8   : > { %v373_v62 = vrot.slane %v372_v59, 4  ;;  %v403_v63 = vadd.f32 %v402_v61, %v401_v60 }
  0xfa   : > { %v374_v0 = vadd.f32 %v373_v62, %v372_v59  ;;  %v404_v1 = vrot.slane %v403_v63, 4 }
  0xfc   : > { %v375_v2 = vrot.slane %v374_v0, 2  ;;  %v405_v3 = vadd.f32 %v404_v1, %v403_v63 }
  0xfe   : > { %v376_v4 = vadd.f32 %v375_v2, %v374_v0  ;;  %v406_v5 = vrot.slane %v405_v3, 2 }
 0x100   : > { %v377_v6 = vrot.slane %v376_v4, 1  ;;  %v407_v7 = vadd.f32 %v406_v5, %v405_v3 }
 0x102   : > { %v378_v8 = vadd.f32 %v377_v6, %v376_v4  ;;  %v408_v9 = vrot.slane %v407_v7, 1 }
 0x104   : > { %380 = vst.msk [vmem:[%s641_s28] sm:$0x1] %vm379_vm5, %v378_v8  ;;  %v409_v10 = vadd.f32 %v408_v9, %v407_v7 }
 0x106   : > { %410 = vst.msk [vmem:[%s641_s28 + $0x1] sm:$0x1] %vm379_vm5, %v409_v10 }
 0x107 PF: > { %s14_s12 = sadd.s32 1, %s590_s12  }
 0x108   : > { %p11_p5 = scmp.ge.s32.totalorder %s14_s12, 4  }
 0x10a   :  { %13 = sbr.rel (!%p11_p5) target bundleno = 1 (0x1), region = 70 }

// kernel: residual_block_forward.10
= control target key start
LH: loop header
LB: loop body
LE: loop exit
PB: predicated region body
PF: predicated region fallthrough
CT: control target
= control target key end

     0   :  { %s643_s12 = smov 0   ;;  %s733_s0 = inlined_call_operand.vmem [shape: bf16[128,72], index: 0, kind: input, shape index: {}]   ;;  %s734_s1 = inlined_call_operand.vmem [shape: bf16[72,8], index: 1, kind: input, shape index: {}]   ;;  %s735_s2 = inlined_call_operand.vmem [shape: bf16[128,8], index: 2, kind: output, shape index: {0}]   ;;  %s736_s3 = inlined_call_operand.vmem [shape: f32[16,8], index: 3, kind: output, shape index: {1}]  }
   0x1 LB: > { %s649_s13 = sadd.s32 4294967295, %s620_s12   ;;  %p520_p0 = scmp.ge.s32.totalorder %s620_s12, 1  ;;  %s620_s12 = sphi %s643_s12, %s14_s12  }
   0x2   : > { %p141_p1 = scmp.lt.s32.totalorder %s620_s12, 3 }
   0x4   : > { %p142_p2 = pnand %p520_p0, %p141_p1 }
   0x5   : > { %v605_v0 = vld [vmem:[%s734_s1] sm:$0xff] (!%p142_p2)   ;;  %v606_v1 = vld [vmem:[%s734_s1 + $0x8] sm:$0xff] (!%p142_p2)   ;;  %s521_s18 = sshll.u32 (!%p142_p2), %s649_s13, 3  ;;  %v607_v2 = vld [vmem:[%s734_s1 + $0x10] sm:$0xff] (!%p142_p2)   ;;  %vm250_vm0 = vcmask (!%p142_p2), 588800   ;;  %vm263_vm1 = vcmask (!%p142_p2), 1043456  }
   0x6   : > { %145 = sbr.rel (%p142_p2) target bundleno = 271 (0x10f), region = 28  ;;  %566 = vmatprep.subr.bf16.mxu0 (!%p142_p2), %v605_v0  ;;  %584 = vmatprep.subr.bf16.mxu1 (!%p142_p2), %v605_v0  ;;  %p170_p3 = scmp.lt.s32.totalorder (!%p142_p2), %s521_s18, 15  ;;  %v608_v3 = vld [vmem:[%s734_s1 + $0x18] sm:$0xff] (!%p142_p2)   ;;  %v609_v6 = vld [vmem:[%s734_s1 + $0x20] ss:$0 sps:$4 sm:$0xff] (!%p142_p2)   ;;  %vm427_vm2 = vcmask (!%p142_p2), 62464  }
   0x7   : > { %567 = vmatpush3.bf16.msra.mxu0 (!%p142_p2), %v605_v0  ;;  %589 = vmatpush3.bf16.msra.mxu1 (!%p142_p2), %v605_v0  ;;  %v265_v7 = vsel (!%p142_p2), %vm263_vm1, %v609_v6, 0  ;;  %p181_p4 = scmp.lt.s32.totalorder (!%p142_p2), %s649_s13, 1  ;;  %v622_v10 = vmov (!%p142_p2), 0.0   ;;  %vm364_vm3 = vcmask (!%p142_p2), 60416   ;;  %vm373_vm4 = vcmask (!%p142_p2), 64512  }
   0x8   : > { %568 = vmatprep.subr.bf16.mxu0 (!%p142_p2), %v606_v1  ;;  %585 = vmatprep.subr.bf16.mxu1 (!%p142_p2), %v606_v1  ;;  %vm395_vm5 = vcmask (!%p142_p2), 57344  }
   0xb   : > { %569 = vmatpush3.bf16.msra.mxu0 (!%p142_p2), %v606_v1  ;;  %590 = vmatpush3.bf16.msra.mxu1 (!%p142_p2), %v606_v1 }
   0xc   : > { %570 = vmatprep.subr.bf16.mxu0 (!%p142_p2), %v607_v2  ;;  %586 = vmatprep.subr.bf16.mxu1 (!%p142_p2), %v607_v2 }
   0xd   : > { %s738_s18 = smov (!%p170_p3, %s521_s18), 15  ;;  %s740_s13 = smov (!%p181_p4, %s649_s13), 1 }
   0xe   : > { %s522_s21 = sshll.u32 %s738_s18, 2  ;;  %s525_s29 = sshll.u32 %s740_s13, 3 }
   0xf   : > { %s173_s26 = scalar_lea.vmem %s733_s0, %s522_s21  ;;  %571 = vmatpush3.bf16.msra.mxu0 %v607_v2  ;;  %591 = vmatpush3.bf16.msra.mxu1 %v607_v2  ;;  %s686_s5 = scalar_lea.vmem %s736_s3, %s525_s29 }
  0x10   : > { %v610_v4 = vld [vmem:[%s173_s26] sm:$0xff]   ;;  %v612_v5 = vld [vmem:[%s173_s26 + $0x10] sm:$0xff]   ;;  %572 = vmatprep.subr.bf16.mxu0 %v608_v3  ;;  %587 = vmatprep.subr.bf16.mxu1 %v608_v3  ;;  %v611_v8 = vld [vmem:[%s173_s26 + $0x8] sm:$0xff]   ;;  %428 = vst.msk [vmem:[%s686_s5 + $0x2] sm:$0x3f] %vm427_vm2, %v622_v10  ;;  %s694_s8 = scalar_lea.vmem %s735_s2, %s522_s21 }
  0x11   : > { %576 = vmatprep.mubr.msk.bf16.mxu0 %vm250_vm0, %v610_v4  ;;  %580 = vmatprep.mubr.msk.bf16.mxu1 %vm250_vm0, %v612_v5  ;;  %v613_v9 = vld [vmem:[%s173_s26 + $0x18] sm:$0xff]  }
  0x13   : > { %573 = vmatpush3.bf16.msra.mxu0 %v608_v3  ;;  %592 = vmatpush3.bf16.msra.mxu1 %v608_v3 }
  0x14   : > { %594 = vmatprep.subr.msk.bf16.mxu0 %vm263_vm1, %v609_v6  ;;  %595 = vmatprep.subr.msk.bf16.mxu1 %vm263_vm1, %v609_v6 }
  0x17   : > { %575 = vmatpush3.bf16.msra.mxu0 %v265_v7  ;;  %593 = vmatpush3.bf16.msra.mxu1 %v265_v7 }
  0x1a   : > { %577 = vmatmul.mubr.msk.bf16.vlgmr.msra.gmra.mrb[0].mxu0 %vm250_vm0, %v611_v8  ;;  %581 = vmatmul.mubr.msk.bf16.vlgmr.msra.gmra.mrb[0].mxu1 %vm250_vm0, %v613_v9 }
  0xed   : > { %v578_v11 = vpop.f32.mrb[0].mxu0  ;;  %v582_v12 = vpop.f32.mrb[0].mxu1 }
  0xee   : > { %v551_v13 = vpack.c.bf16 %v578_v11, %v578_v11  ;;  %v301_v14 = vpop.f32.mrb[1].mxu0  ;;  %v555_v15 = vpack.c.bf16 %v582_v12, %v582_v12  ;;  %v317_v16 = vpop.f32.mrb[1].mxu1  ;;  %v399_v21 = vmul.f32 %v578_v11, %v578_v11  ;;  %v377_v29 = vsel %vm373_vm4, %v578_v11, 0.0 }
  0xef   : > { %v549_v17 = vpack.c.bf16 %v301_v14, %v301_v14  ;;  %v397_v18 = vmul.f32 %v301_v14, %v301_v14  ;;  %v579_v19 = vpop.f32.mrb[2].mxu0  ;;  %v583_v20 = vpop.f32.mrb[2].mxu1  ;;  %v374_v25 = vsel %vm373_vm4, %v301_v14, 0.0  ;;  %v553_v32 = vpack.c.bf16 %v317_v16, %v317_v16 }
  0xf0   : > { %367 = vst.msk [vmem:[%s694_s8 + $0x8] sm:$0xf] %vm364_vm3, %v551_v13  ;;  %v552_v22 = vpack.c.bf16 %v579_v19, %v579_v19  ;;  %v304_v23 = vpop.f32.mrb[3].mxu0  ;;  %371 = vst.msk [vmem:[%s694_s8 + $0x18] sm:$0xf] %vm364_vm3, %v555_v15  ;;  %v320_v24 = vpop.f32.mrb[3].mxu1  ;;  %v400_v30 = vmul.f32 %v579_v19, %v579_v19  ;;  %v401_v35 = vmul.f32 %v317_v16, %v317_v16 }
  0xf1   : > { %365 = vst.msk [vmem:[%s694_s8] sm:$0xf] %vm364_vm3, %v549_v17  ;;  %v550_v26 = vpack.c.bf16 %v304_v23, %v304_v23  ;;  %v375_v27 = vsel %vm373_vm4, %v304_v23, 0.0  ;;  %v398_v28 = vmul.f32 %v304_v23, %v304_v23  ;;  %v405_v33 = vsel %vm373_vm4, %v397_v18, 0.0  ;;  %369 = vst.msk [vmem:[%s694_s8 + $0x10] sm:$0xf] %vm364_vm3, %v553_v32 }
  0xf2   : > { %368 = vst.msk [vmem:[%s694_s8 + $0xc] sm:$0xf] %vm364_vm3, %v552_v22  ;;  %v376_v31 = vadd.f32 %v375_v27, %v374_v25  ;;  %v556_v36 = vpack.c.bf16 %v583_v20, %v583_v20  ;;  %v408_v39 = vsel %vm373_vm4, %v399_v21, 0.0  ;;  %v379_v40 = vsel %vm373_vm4, %v579_v19, 0.0 }
  0xf3   : > { %366 = vst.msk [vmem:[%s694_s8 + $0x4] sm:$0xf] %vm364_vm3, %v550_v26  ;;  %v406_v34 = vsel %vm373_vm4, %v398_v28, 0.0  ;;  %v381_v41 = vsel %vm373_vm4, %v317_v16, 0.0  ;;  %v554_v42 = vpack.c.bf16 %v320_v24, %v320_v24  ;;  %v410_v45 = vsel %vm373_vm4, %v400_v30, 0.0 }
  0xf4   : > { %v378_v37 = vadd.f32 %v377_v29, %v376_v31  ;;  %v407_v38 = vadd.f32 %v406_v34, %v405_v33  ;;  %372 = vst.msk [vmem:[%s694_s8 + $0x1c] sm:$0xf] %vm364_vm3, %v556_v36  ;;  %v412_v46 = vsel %vm373_vm4, %v401_v35, 0.0  ;;  %v402_v47 = vmul.f32 %v320_v24, %v320_v24 }
  0xf5   : > { %370 = vst.msk [vmem:[%s694_s8 + $0x14] sm:$0xf] %vm364_vm3, %v554_v42  ;;  %v403_v50 = vmul.f32 %v582_v12, %v582_v12  ;;  %v383_v51 = vsel %vm373_vm4, %v320_v24, 0.0  ;;  %v385_v54 = vsel %vm373_vm4, %v582_v12, 0.0  ;;  %v404_v55 = vmul.f32 %v583_v20, %v583_v20 }
  0xf6   : > { %v409_v43 = vadd.f32 %v408_v39, %v407_v38  ;;  %v380_v44 = vadd.f32 %v379_v40, %v378_v37  ;;  %v414_v56 = vsel %vm373_vm4, %v402_v47, 0.0  ;;  %v387_v60 = vsel %vm373_vm4, %v583_v20, 0.0 }
  0xf7   : > { %v416_v59 = vsel %vm373_vm4, %v403_v50, 0.0  ;;  %v418_v63 = vsel %vm373_vm4, %v404_v55, 0.0 }
  0xf8   : > { %v382_v48 = vadd.f32 %v381_v41, %v380_v44  ;;  %v411_v49 = vadd.f32 %v410_v45, %v409_v43 }
  0xfa   : > { %v413_v52 = vadd.f32 %v412_v46, %v411_v49  ;;  %v384_v53 = vadd.f32 %v383_v51, %v382_v48 }
  0xfc   : > { %v386_v57 = vadd.f32 %v385_v54, %v384_v53  ;;  %v415_v58 = vadd.f32 %v414_v56, %v413_v52 }
  0xfe   : > { %v388_v61 = vadd.f32 %v387_v60, %v386_v57  ;;  %v417_v62 = vadd.f32 %v416_v59, %v415_v58 }
 0x100   : > { %v389_v0 = vrot.slane %v388_v61, 4  ;;  %v419_v1 = vadd.f32 %v418_v63, %v417_v62 }
 0x102   : > { %v390_v2 = vadd.f32 %v389_v0, %v388_v61  ;;  %v420_v3 = vrot.slane %v419_v1, 4 }
 0x104   : > { %v391_v4 = vrot.slane %v390_v2, 2  ;;  %v421_v5 = vadd.f32 %v420_v3, %v419_v1 }
 0x106   : > { %v392_v6 = vadd.f32 %v391_v4, %v390_v2  ;;  %v422_v7 = vrot.slane %v421_v5, 2 }
 0x108   : > { %v393_v8 = vrot.slane %v392_v6, 1  ;;  %v423_v9 = vadd.f32 %v422_v7, %v421_v5 }
 0x10a   : > { %v394_v10 = vadd.f32 %v393_v8, %v392_v6  ;;  %v424_v11 = vrot.slane %v423_v9, 1 }
 0x10c   : > { %396 = vst.msk [vmem:[%s686_s5] sm:$0x1] %vm395_vm5, %v394_v10  ;;  %v425_v12 = vadd.f32 %v424_v11, %v423_v9 }
 0x10e   : > { %426 = vst.msk [vmem:[%s686_s5 + $0x1] sm:$0x1] %vm395_vm5, %v425_v12 }
 0x10f PF: > { %s14_s12 = sadd.s32 1, %s620_s12  }
 0x110   : > { %p11_p5 = scmp.ge.s32.totalorder %s14_s12, 4  }
 0x112   :  { %13 = sbr.rel (!%p11_p5) target bundleno = 1 (0x1), region = 70 }

// kernel: residual_block_forward.8
= control target key start
LH: loop header
LB: loop body
LE: loop exit
PB: predicated region body
PF: predicated region fallthrough
CT: control target
= control target key end

     0   :  { %s578_s12 = smov 0   ;;  %s640_s0 = inlined_call_operand.vmem [shape: bf16[128,4], index: 0, kind: input, shape index: {}]   ;;  %s641_s1 = inlined_call_operand.vmem [shape: bf16[4,8], index: 1, kind: input, shape index: {}]   ;;  %s642_s2 = inlined_call_operand.vmem [shape: bf16[128,8], index: 2, kind: output, shape index: {0}]   ;;  %s643_s3 = inlined_call_operand.vmem [shape: f32[16,8], index: 3, kind: output, shape index: {1}]  }
   0x1 LB: > { %s481_s13 = sadd.s32 4294967295, %s555_s12   ;;  %p485_p0 = scmp.ge.s32.totalorder %s555_s12, 1  ;;  %s555_s12 = sphi %s578_s12, %s14_s12  }
   0x2   : > { %p141_p1 = scmp.lt.s32.totalorder %s555_s12, 3 }
   0x4   : > { %p142_p2 = pnand %p485_p0, %p141_p1 }
   0x5   : > { %v194_v0 = vld [vmem:[%s641_s1] sm:$0x3] (!%p142_p2)  ;;  %vm228_vm0 = vcmask (!%p142_p2), 1041408   ;;  %s486_s16 = sshll.u32 (!%p142_p2), %s481_s13, 3  ;;  %vm215_vm1 = vcmask (!%p142_p2), 31744   ;;  %p181_p4 = scmp.lt.s32.totalorder (!%p142_p2), %s481_s13, 1 }
   0x6   : > { %145 = sbr.rel (%p142_p2) target bundleno = 263 (0x107), region = 28  ;;  %534 = vmatprep.subr.msk.bf16.mxu0 (!%p142_p2), %vm228_vm0, %v194_v0  ;;  %v230_v1 = vsel (!%p142_p2), %vm228_vm0, %v194_v0, 0  ;;  %p170_p3 = scmp.lt.s32.totalorder (!%p142_p2), %s486_s16, 15  ;;  %535 = vmatprep.subr.msk.bf16.mxu1 (!%p142_p2), %vm228_vm0, %v194_v0  ;;  %vm392_vm2 = vcmask (!%p142_p2), 62464   ;;  %v557_v6 = vmov (!%p142_p2), 0.0   ;;  %vm329_vm3 = vcmask (!%p142_p2), 60416  }
   0x7   : > { %523 = vmatpush3.bf16.msra.mxu0 (!%p142_p2), %v230_v1  ;;  %533 = vmatpush3.bf16.msra.mxu1 (!%p142_p2), %v230_v1  ;;  %vm338_vm4 = vcmask (!%p142_p2), 64512   ;;  %vm360_vm5 = vcmask (!%p142_p2), 57344  }
   0xd   : > { %s645_s16 = smov (!%p170_p3, %s486_s16), 15  ;;  %s647_s13 = smov (!%p181_p4, %s481_s13), 1 }
   0xe   : > { %s487_s17 = sshll.u32 %s645_s16, 2  ;;  %s490_s21 = sshll.u32 %s647_s13, 3 }
   0xf   : > { %s173_s20 = scalar_lea.vmem %s640_s0, %s487_s17  ;;  %s595_s24 = scalar_lea.vmem %s643_s3, %s490_s21 }
  0x10   : > { %v545_v2 = vld [vmem:[%s173_s20] sm:$0xff]   ;;  %v546_v3 = vld [vmem:[%s173_s20 + $0x8] sm:$0xff]   ;;  %v547_v4 = vld [vmem:[%s173_s20 + $0x10] sm:$0xff]   ;;  %393 = vst.msk [vmem:[%s595_s24 + $0x2] sm:$0x3f] %vm392_vm2, %v557_v6  ;;  %s601_s27 = scalar_lea.vmem %s642_s2, %s487_s17 }
  0x11   : > { %524 = vmatprep.mubr.msk.bf16.mxu0 %vm215_vm1, %v545_v2  ;;  %v548_v5 = vld [vmem:[%s173_s20 + $0x18] sm:$0xff]   ;;  %528 = vmatprep.mubr.msk.bf16.mxu1 %vm215_vm1, %v547_v4 }
  0x12   : > { %525 = vmatmul.mubr.msk.bf16.vlgmr.msra.gmra.mrb[0].mxu0 %vm215_vm1, %v546_v3  ;;  %529 = vmatmul.mubr.msk.bf16.vlgmr.msra.gmra.mrb[0].mxu1 %vm215_vm1, %v548_v5 }
  0xe5   : > { %v526_v7 = vpop.f32.mrb[0].mxu0  ;;  %v530_v13 = vpop.f32.mrb[0].mxu1 }
  0xe6   : > { %v511_v8 = vpack.c.bf16 %v526_v7, %v526_v7  ;;  %v266_v9 = vpop.f32.mrb[1].mxu0  ;;  %v364_v14 = vmul.f32 %v526_v7, %v526_v7  ;;  %v282_v17 = vpop.f32.mrb[1].mxu1  ;;  %v342_v23 = vsel %vm338_vm4, %v526_v7, 0.0  ;;  %v515_v25 = vpack.c.bf16 %v530_v13, %v530_v13 }
  0xe7   : > { %v509_v10 = vpack.c.bf16 %v266_v9, %v266_v9  ;;  %v362_v11 = vmul.f32 %v266_v9, %v266_v9  ;;  %v527_v12 = vpop.f32.mrb[2].mxu0  ;;  %v339_v18 = vsel %vm338_vm4, %v266_v9, 0.0  ;;  %v531_v22 = vpop.f32.mrb[2].mxu1  ;;  %v513_v30 = vpack.c.bf16 %v282_v17, %v282_v17 }
  0xe8   : > { %332 = vst.msk [vmem:[%s601_s27 + $0x8] sm:$0xf] %vm329_vm3, %v511_v8  ;;  %v512_v15 = vpack.c.bf16 %v527_v12, %v527_v12  ;;  %v269_v16 = vpop.f32.mrb[3].mxu0  ;;  %v285_v26 = vpop.f32.mrb[3].mxu1  ;;  %v365_v28 = vmul.f32 %v527_v12, %v527_v12  ;;  %336 = vst.msk [vmem:[%s601_s27 + $0x18] sm:$0xf] %vm329_vm3, %v515_v25  ;;  %v366_v33 = vmul.f32 %v282_v17, %v282_v17 }
  0xe9   : > { %330 = vst.msk [vmem:[%s601_s27] sm:$0xf] %vm329_vm3, %v509_v10  ;;  %v510_v19 = vpack.c.bf16 %v269_v16, %v269_v16  ;;  %v340_v20 = vsel %vm338_vm4, %v269_v16, 0.0  ;;  %v363_v21 = vmul.f32 %v269_v16, %v269_v16  ;;  %v370_v27 = vsel %vm338_vm4, %v362_v11, 0.0  ;;  %334 = vst.msk [vmem:[%s601_s27 + $0x10] sm:$0xf] %vm329_vm3, %v513_v30 }
  0xea   : > { %333 = vst.msk [vmem:[%s601_s27 + $0xc] sm:$0xf] %vm329_vm3, %v512_v15  ;;  %v341_v24 = vadd.f32 %v340_v20, %v339_v18  ;;  %v516_v34 = vpack.c.bf16 %v531_v22, %v531_v22  ;;  %v373_v35 = vsel %vm338_vm4, %v364_v14, 0.0  ;;  %v344_v36 = vsel %vm338_vm4, %v527_v12, 0.0 }
  0xeb   : > { %331 = vst.msk [vmem:[%s601_s27 + $0x4] sm:$0xf] %vm329_vm3, %v510_v19  ;;  %v371_v29 = vsel %vm338_vm4, %v363_v21, 0.0  ;;  %v346_v37 = vsel %vm338_vm4, %v282_v17, 0.0  ;;  %v514_v38 = vpack.c.bf16 %v285_v26, %v285_v26  ;;  %v375_v41 = vsel %vm338_vm4, %v365_v28, 0.0 }
  0xec   : > { %v343_v31 = vadd.f32 %v342_v23, %v341_v24  ;;  %v372_v32 = vadd.f32 %v371_v29, %v370_v27  ;;  %337 = vst.msk [vmem:[%s601_s27 + $0x1c] sm:$0xf] %vm329_vm3, %v516_v34  ;;  %v377_v42 = vsel %vm338_vm4, %v366_v33, 0.0  ;;  %v367_v43 = vmul.f32 %v285_v26, %v285_v26 }
  0xed   : > { %335 = vst.msk [vmem:[%s601_s27 + $0x14] sm:$0xf] %vm329_vm3, %v514_v38  ;;  %v368_v46 = vmul.f32 %v530_v13, %v530_v13  ;;  %v348_v47 = vsel %vm338_vm4, %v285_v26, 0.0  ;;  %v350_v50 = vsel %vm338_vm4, %v530_v13, 0.0  ;;  %v369_v51 = vmul.f32 %v531_v22, %v531_v22 }
  0xee   : > { %v374_v39 = vadd.f32 %v373_v35, %v372_v32  ;;  %v345_v40 = vadd.f32 %v344_v36, %v343_v31  ;;  %v379_v52 = vsel %vm338_vm4, %v367_v43, 0.0  ;;  %v352_v56 = vsel %vm338_vm4, %v531_v22, 0.0 }
  0xef   : > { %v381_v55 = vsel %vm338_vm4, %v368_v46, 0.0  ;;  %v383_v59 = vsel %vm338_vm4, %v369_v51, 0.0 }
  0xf0   : > { %v347_v44 = vadd.f32 %v346_v37, %v345_v40  ;;  %v376_v45 = vadd.f32 %v375_v41, %v374_v39 }
  0xf2   : > { %v378_v48 = vadd.f32 %v377_v42, %v376_v45  ;;  %v349_v49 = vadd.f32 %v348_v47, %v347_v44 }
  0xf4   : > { %v351_v53 = vadd.f32 %v350_v50, %v349_v49  ;;  %v380_v54 = vadd.f32 %v379_v52, %v378_v48 }
  0xf6   : > { %v353_v57 = vadd.f32 %v352_v56, %v351_v53  ;;  %v382_v58 = vadd.f32 %v381_v55, %v380_v54 }
  0xf8   : > { %v354_v60 = vrot.slane %v353_v57, 4  ;;  %v384_v61 = vadd.f32 %v383_v59, %v382_v58 }
  0xfa   : > { %v355_v62 = vadd.f32 %v354_v60, %v353_v57  ;;  %v385_v63 = vrot.slane %v384_v61, 4 }
  0xfc   : > { %v356_v0 = vrot.slane %v355_v62, 2  ;;  %v386_v1 = vadd.f32 %v385_v63, %v384_v61 }
  0xfe   : > { %v357_v2 = vadd.f32 %v356_v0, %v355_v62  ;;  %v387_v3 = vrot.slane %v386_v1, 2 }
 0x100   : > { %v358_v4 = vrot.slane %v357_v2, 1  ;;  %v388_v5 = vadd.f32 %v387_v3, %v386_v1 }
 0x102   : > { %v359_v6 = vadd.f32 %v358_v4, %v357_v2  ;;  %v389_v7 = vrot.slane %v388_v5, 1 }
 0x104   : > { %361 = vst.msk [vmem:[%s595_s24] sm:$0x1] %vm360_vm5, %v359_v6  ;;  %v390_v8 = vadd.f32 %v389_v7, %v388_v5 }
 0x106   : > { %391 = vst.msk [vmem:[%s595_s24 + $0x1] sm:$0x1] %vm360_vm5, %v390_v8 }
 0x107 PF: > { %s14_s12 = sadd.s32 1, %s555_s12  }
 0x108   : > { %p11_p5 = scmp.ge.s32.totalorder %s14_s12, 4  }
 0x10a   :  { %13 = sbr.rel (!%p11_p5) target bundleno = 1 (0x1), region = 70 }

// kernel: residual_block_forward.9
= control target key start
LH: loop header
LB: loop body
LE: loop exit
PB: predicated region body
PF: predicated region fallthrough
CT: control target
= control target key end

     0   :  { %s365_s9 = smov 0   ;;  %s403_s0 = inlined_call_operand.vmem [shape: bf16[128,8], index: 0, kind: input, shape index: {}, may-alias: {0,2}]   ;;  %s404_s1 = inlined_call_operand.vmem [shape: f32[8,8], index: 1, kind: input, shape index: {}]   ;;  %s405_s2 = inlined_call_operand.vmem [shape: bf16[128,8], index: 2, kind: output, shape index: {}, may-alias: {0,2}]  }
   0x1 LB: > { %s286_s10 = sadd.s32 4294967295, %s348_s9   ;;  %p290_p0 = scmp.ge.s32.totalorder %s348_s9, 1  ;;  %s348_s9 = sphi %s365_s9, %s12_s9  }
   0x2   : > { %p113_p1 = scmp.lt.s32.totalorder %s348_s9, 3 }
   0x4   : > { %p114_p2 = pnand %p290_p0, %p113_p1 }
   0x5   : > { %s291_s11 = sshll.u32 (!%p114_p2), %s286_s10, 3  ;;  %v295_v0 = vld [vmem:[%s404_s1] ss:$0 sm:$0xff] (!%p114_p2)  ;;  %vm221_vm0 = vcmask (!%p114_p2), 60416   ;;  %v296_v9 = vld [vmem:[%s404_s1 + $0x1] ss:$0 sm:$0xff] (!%p114_p2) }
   0x6   : > { %117 = sbr.rel (%p114_p2) target bundleno = 29 (0x1d), region = 28  ;;  %p136_p3 = scmp.lt.s32.totalorder (!%p114_p2), %s291_s11, 15 }
   0xd   : > { %s407_s11 = smov (!%p136_p3, %s291_s11), 15 }
   0xe   : > { %s292_s12 = sshll.u32 %s407_s11, 2 }
   0xf   : > { %s139_s15 = scalar_lea.vmem %s403_s0, %s292_s12  ;;  %s145_s22 = scalar_lea.vmem %s405_s2, %s292_s12 }
  0x10   : > { %v316_v1 = vld [vmem:[%s139_s15] sm:$0xff]   ;;  %v331_v2 = vld [vmem:[%s139_s15 + $0x8] sm:$0xff]   ;;  %v332_v3 = vld [vmem:[%s139_s15 + $0x10] sm:$0xff]  }
  0x11   : > { %v317_v4 = vunpack.c.l.bf16 %v316_v1  ;;  %v333_v5 = vld [vmem:[%s139_s15 + $0x18] sm:$0xff]   ;;  %v318_v6 = vunpack.c.h.bf16 %v316_v1  ;;  %v321_v7 = vunpack.c.l.bf16 %v331_v2  ;;  %v322_v8 = vunpack.c.h.bf16 %v331_v2 }
  0x12   : > { %v325_v10 = vunpack.c.l.bf16 %v332_v3  ;;  %v326_v11 = vunpack.c.h.bf16 %v332_v3  ;;  %v329_v12 = vunpack.c.l.bf16 %v333_v5  ;;  %v330_v13 = vunpack.c.h.bf16 %v333_v5 }
  0x13   : > { %v168_v14 = vmul.f32 %v317_v4, %v295_v0  ;;  %v169_v15 = vmul.f32 %v318_v6, %v295_v0  ;;  %v170_v16 = vmul.f32 %v321_v7, %v295_v0  ;;  %v171_v17 = vmul.f32 %v322_v8, %v295_v0 }
  0x14   : > { %v172_v18 = vmul.f32 %v325_v10, %v295_v0  ;;  %v173_v19 = vmul.f32 %v326_v11, %v295_v0  ;;  %v174_v20 = vmul.f32 %v329_v12, %v295_v0  ;;  %v175_v21 = vmul.f32 %v330_v13, %v295_v0 }
  0x15   : > { %v181_v22 = vadd.f32 %v296_v9, %v168_v14  ;;  %v182_v23 = vadd.f32 %v296_v9, %v169_v15  ;;  %v183_v24 = vadd.f32 %v296_v9, %v170_v16  ;;  %v184_v25 = vadd.f32 %v296_v9, %v171_v17 }
  0x16   : > { %v185_v26 = vadd.f32 %v296_v9, %v172_v18  ;;  %v186_v27 = vadd.f32 %v296_v9, %v173_v19  ;;  %v187_v28 = vadd.f32 %v296_v9, %v174_v20  ;;  %v188_v29 = vadd.f32 %v296_v9, %v175_v21 }
  0x17   : > { %v307_v30 = vpack.c.bf16 %v181_v22, %v181_v22  ;;  %v308_v31 = vpack.c.bf16 %v182_v23, %v182_v23  ;;  %v309_v32 = vpack.c.bf16 %v183_v24, %v183_v24  ;;  %v310_v33 = vpack.c.bf16 %v184_v25, %v184_v25 }
  0x18   : > { %v311_v34 = vpack.c.bf16 %v185_v26, %v185_v26  ;;  %v312_v35 = vpack.c.bf16 %v186_v27, %v186_v27  ;;  %v313_v36 = vpack.c.bf16 %v187_v28, %v187_v28  ;;  %v314_v37 = vpack.c.bf16 %v188_v29, %v188_v29 }
  0x19   : > { %222 = vst.msk [vmem:[%s145_s22] sm:$0xf] %vm221_vm0, %v307_v30  ;;  %223 = vst.msk [vmem:[%s145_s22 + $0x4] sm:$0xf] %vm221_vm0, %v308_v31 }
  0x1a   : > { %224 = vst.msk [vmem:[%s145_s22 + $0x8] sm:$0xf] %vm221_vm0, %v309_v32  ;;  %225 = vst.msk [vmem:[%s145_s22 + $0xc] sm:$0xf] %vm221_vm0, %v310_v33 }
  0x1b   : > { %226 = vst.msk [vmem:[%s145_s22 + $0x10] sm:$0xf] %vm221_vm0, %v311_v34  ;;  %227 = vst.msk [vmem:[%s145_s22 + $0x14] sm:$0xf] %vm221_vm0, %v312_v35 }
  0x1c   : > { %228 = vst.msk [vmem:[%s145_s22 + $0x18] sm:$0xf] %vm221_vm0, %v313_v36  ;;  %229 = vst.msk [vmem:[%s145_s22 + $0x1c] sm:$0xf] %vm221_vm0, %v314_v37 }
  0x1d PF: > { %s12_s9 = sadd.s32 1, %s348_s9  }
  0x1e   : > { %p9_p4 = scmp.ge.s32.totalorder %s12_s9, 4  }
  0x20   :  { %11 = sbr.rel (!%p9_p4) target bundleno = 1 (0x1), region = 58 }

// kernel: residual_block_forward.11
= control target key start
LH: loop header
LB: loop body
LE: loop exit
PB: predicated region body
PF: predicated region fallthrough
CT: control target
= control target key end

     0   :  { %s436_s12 = smov 0   ;;  %s474_s0 = inlined_call_operand.vmem [shape: bf16[128,8], index: 0, kind: input, shape index: {}]   ;;  %s475_s1 = inlined_call_operand.vmem [shape: f32[8,8], index: 1, kind: input, shape index: {}]   ;;  %s476_s2 = inlined_call_operand.vmem [shape: bf16[128,8], index: 2, kind: input, shape index: {}]   ;;  %s477_s3 = inlined_call_operand.vmem [shape: f32[128,8], index: 3, kind: output, shape index: {}]  }
   0x1 LB: > { %s347_s13 = sadd.s32 4294967295, %s414_s12   ;;  %p351_p0 = scmp.ge.s32.totalorder %s414_s12, 1  ;;  %s414_s12 = sphi %s436_s12, %s13_s12  }
   0x2   : > { %p149_p1 = scmp.lt.s32.totalorder %s414_s12, 3 }
   0x4   : > { %p150_p2 = pnand %p351_p0, %p149_p1 }
   0x5   : > { %s352_s14 = sshll.u32 (!%p150_p2), %s347_s13, 3  ;;  %v358_v0 = vld [vmem:[%s475_s1] ss:$0 sm:$0xff] (!%p150_p2)  ;;  %vm270_vm0 = vcmask (!%p150_p2), 64512   ;;  %v359_v11 = vld [vmem:[%s475_s1 + $0x1] ss:$0 sm:$0xff] (!%p150_p2) }
   0x6   : > { %153 = sbr.rel (%p150_p2) target bundleno = 35 (0x23), region = 32  ;;  %p179_p3 = scmp.lt.s32.totalorder (!%p150_p2), %s352_s14, 15 }
   0xd   : > { %s479_s14 = smov (!%p179_p3, %s352_s14), 15 }
   0xe   : > { %s353_s15 = sshll.u32 %s479_s14, 2  ;;  %s357_s26 = sshll.u32 %s479_s14, 3 }
   0xf   : > { %s182_s18 = scalar_lea.vmem %s474_s0, %s353_s15  ;;  %s188_s21 = scalar_lea.vmem %s476_s2, %s353_s15 }
  0x10   : > { %v363_v1 = vld [vmem:[%s182_s18] sm:$0xff]   ;;  %v394_v3 = vld [vmem:[%s182_s18 + $0x8] sm:$0xff]   ;;  %v395_v9 = vld [vmem:[%s182_s18 + $0x10] sm:$0xff]   ;;  %s194_s29 = scalar_lea.vmem %s477_s3, %s357_s26 }
  0x11   : > { %v379_v2 = vld [vmem:[%s188_s21] sm:$0xff]   ;;  %v364_v4 = vunpack.c.l.bf16 %v363_v1  ;;  %v365_v6 = vunpack.c.h.bf16 %v363_v1  ;;  %v397_v8 = vld [vmem:[%s188_s21 + $0x8] sm:$0xff]   ;;  %v398_v10 = vld [vmem:[%s188_s21 + $0x10] sm:$0xff]   ;;  %v368_v12 = vunpack.c.l.bf16 %v394_v3  ;;  %v369_v14 = vunpack.c.h.bf16 %v394_v3 }
  0x12   : > { %v380_v5 = vunpack.c.l.bf16 %v379_v2  ;;  %v381_v7 = vunpack.c.h.bf16 %v379_v2  ;;  %v384_v13 = vunpack.c.l.bf16 %v397_v8  ;;  %v385_v15 = vunpack.c.h.bf16 %v397_v8  ;;  %v396_v16 = vld [vmem:[%s182_s18 + $0x18] sm:$0xff]  }
  0x13   : > { %v217_v17 = vmul.f32 %v364_v4, %v358_v0  ;;  %v218_v18 = vmul.f32 %v365_v6, %v358_v0  ;;  %v372_v19 = vunpack.c.l.bf16 %v395_v9  ;;  %v388_v20 = vunpack.c.l.bf16 %v398_v10  ;;  %v399_v21 = vld [vmem:[%s188_s21 + $0x18] sm:$0xff]  }
  0x14   : > { %v219_v22 = vmul.f32 %v368_v12, %v358_v0  ;;  %v220_v23 = vmul.f32 %v369_v14, %v358_v0  ;;  %v373_v24 = vunpack.c.h.bf16 %v395_v9  ;;  %v389_v25 = vunpack.c.h.bf16 %v398_v10 }
  0x15   : > { %v230_v26 = vadd.f32 %v359_v11, %v217_v17  ;;  %v231_v27 = vadd.f32 %v359_v11, %v218_v18  ;;  %v221_v28 = vmul.f32 %v372_v19, %v358_v0  ;;  %v376_v29 = vunpack.c.l.bf16 %v396_v16 }
  0x16   : > { %v232_v30 = vadd.f32 %v359_v11, %v219_v22  ;;  %v233_v31 = vadd.f32 %v359_v11, %v220_v23  ;;  %v222_v32 = vmul.f32 %v373_v24, %v358_v0  ;;  %v392_v33 = vunpack.c.l.bf16 %v399_v21 }
  0x17   : > { %v238_v34 = vmax.f32 %v230_v26, 0.0  ;;  %v239_v35 = vmax.f32 %v231_v27, 0.0  ;;  %v234_v36 = vadd.f32 %v359_v11, %v221_v28  ;;  %v223_v37 = vmul.f32 %v376_v29, %v358_v0 }
  0x18   : > { %v240_v38 = vmax.f32 %v232_v30, 0.0  ;;  %v241_v39 = vmax.f32 %v233_v31, 0.0  ;;  %v235_v40 = vadd.f32 %v359_v11, %v222_v32  ;;  %v377_v41 = vunpack.c.h.bf16 %v396_v16 }
  0x19   : > { %v262_v42 = vadd.f32 %v380_v5, %v238_v34  ;;  %v263_v43 = vadd.f32 %v381_v7, %v239_v35  ;;  %v242_v44 = vmax.f32 %v234_v36, 0.0  ;;  %v236_v45 = vadd.f32 %v359_v11, %v223_v37 }
  0x1a   : > { %v264_v46 = vadd.f32 %v384_v13, %v240_v38  ;;  %v265_v47 = vadd.f32 %v385_v15, %v241_v39  ;;  %v243_v48 = vmax.f32 %v235_v40, 0.0  ;;  %v224_v49 = vmul.f32 %v377_v41, %v358_v0 }
  0x1b   : > { %271 = vst.msk [vmem:[%s194_s29] sm:$0xff] %vm270_vm0, %v262_v42  ;;  %272 = vst.msk [vmem:[%s194_s29 + $0x8] sm:$0xff] %vm270_vm0, %v263_v43  ;;  %v266_v50 = vadd.f32 %v388_v20, %v242_v44  ;;  %v244_v51 = vmax.f32 %v236_v45, 0.0  ;;  %v393_v54 = vunpack.c.h.bf16 %v399_v21 }
  0x1c   : > { %273 = vst.msk [vmem:[%s194_s29 + $0x10] sm:$0xff] %vm270_vm0, %v264_v46  ;;  %274 = vst.msk [vmem:[%s194_s29 + $0x18] sm:$0xff] %vm270_vm0, %v265_v47  ;;  %v267_v52 = vadd.f32 %v389_v25, %v243_v48  ;;  %v237_v53 = vadd.f32 %v359_v11, %v224_v49 }
  0x1d   : > { %275 = vst.msk [vmem:[%s194_s29 + $0x20] sm:$0xff] %vm270_vm0, %v266_v50  ;;  %v268_v55 = vadd.f32 %v392_v33, %v244_v51 }
  0x1e   : > { %276 = vst.msk [vmem:[%s194_s29 + $0x28] sm:$0xff] %vm270_vm0, %v267_v52  ;;  %v245_v56 = vmax.f32 %v237_v53, 0.0 }
  0x1f   : > { %277 = vst.msk [vmem:[%s194_s29 + $0x30] sm:$0xff] %vm270_vm0, %v268_v55 }
  0x20   : > { %v269_v57 = vadd.f32 %v393_v54, %v245_v56 }
  0x22   : > { %278 = vst.msk [vmem:[%s194_s29 + $0x38] sm:$0xff] %vm270_vm0, %v269_v57 }
  0x23 PF: > { %s13_s12 = sadd.s32 1, %s414_s12  }
  0x24   : > { %p10_p4 = scmp.ge.s32.totalorder %s13_s12, 4  }
  0x26   :  { %12 = sbr.rel (!%p10_p4) target bundleno = 1 (0x1), region = 65 }

</bundles_post_ra>
